<compile_context>
chip_gen: v7x
topology: tpu7x:2x2x1
jax: 0.10.0
libtpu: 0.0.40
codegen_flags: <defaults>
</compile_context>

<pallas_src>
import functools

import jax
import jax.numpy as jnp
from jax.experimental import pallas as pl
from jax.experimental.pallas import tpu as pltpu


def _gelu(x):
    return jax.nn.gelu(x, approximate=True)


def _round_up(x, m):
    return (x + m - 1) // m * m


def loupe_classifier_kernel(
    pooled_ref,        # (tb, D)        f32   pooled features ('tok' pooling applied)
    patch_ref,         # (tb, P, D)     f32   patch features (cls token stripped)
    w1g_ref, b1g_ref,  # (D, H) bf16, (1, H) f32   global cls-head layer 1
    w2g_ref, b2g_ref,  # (1, H) f32,  (1, 1) f32   global cls-head layer 2 (row vector)
    w1p_ref, b1p_ref,  # (D, H) bf16, (1, H) f32   patch cls-head layer 1
    w2p_ref, b2p_ref,  # (1, H) f32,  (1, 1) f32   patch cls-head layer 2 (row vector)
    wf_g_ref,          # (1, 1) f32      fuser weight for the global logit
    wf_p_ref,          # (1, P_out) f32  fuser weights for the patch logits (zero padded)
    bf_ref,            # (1, 1) f32      fuser bias
    logits_ref,        # out: (tb, 1) f32       fused classification logits
    patch_logits_ref,  # out: (tb, P_out) f32   per-patch logits (lane-dense, zero padded)
):
    tb, P, D = patch_ref.shape
    H = w1g_ref.shape[1]
    P_out = patch_logits_ref.shape[1]
    bf16 = jnp.bfloat16

    # --- global classification head (LoupeClsHead on pooled features) ---
    pooled = pooled_ref[...].astype(bf16)                               # in-kernel cast
    hg = jnp.dot(pooled, w1g_ref[...],
                 preferred_element_type=jnp.float32)                    # (tb, H) f32
    hg = _gelu(hg + b1g_ref[...])
    # second layer has output dim 1 -> VPU multiply + lane reduce (no N=1 MXU matmul)
    gl = jnp.sum(hg * w2g_ref[...], axis=-1, keepdims=True) + b2g_ref[...]   # (tb, 1)

    # --- patch classification head: one big MXU matmul over flattened rows ---
    patches = patch_ref[...].reshape(tb * P, D).astype(bf16)            # free collapse
    hp = jnp.dot(patches, w1p_ref[...],
                 preferred_element_type=jnp.float32)                    # (tb*P, H) f32
    hp = _gelu(hp + b1p_ref[...])
    hp3 = hp.reshape(tb, P, H)                                          # free split
    plg = jnp.sum(hp3 * w2p_ref[...][None], axis=-1) + b2p_ref[...]     # (tb, P)

    # pad patch logits to a lane-dense (multiple-of-128) width for an unmasked store
    if P_out > P:
        plg_out = jnp.concatenate(
            [plg, jnp.zeros((tb, P_out - P), jnp.float32)], axis=-1)    # (tb, P_out)
    else:
        plg_out = plg

    # --- fusion head: Linear over cat([global_logit, patch_logits], dim=1) ---
    fused = (gl * wf_g_ref[...]
             + jnp.sum(plg_out * wf_p_ref[...], axis=-1, keepdims=True)
             + bf_ref[...])                                             # (tb, 1)

    logits_ref[...] = fused
    patch_logits_ref[...] = plg_out


def init_params(key, D, H, P, scale=0.02):
    """Logical (unpadded) parameters, mirroring the PyTorch module layout."""
    ks = jax.random.split(key, 5)
    return {
        # global cls head: Linear(D,H) -> GELU -> Linear(H,1)
        "cls_w1": scale * jax.random.normal(ks[0], (D, H), jnp.float32),
        "cls_b1": jnp.zeros((H,), jnp.float32),
        "cls_w2": scale * jax.random.normal(ks[1], (H,), jnp.float32),
        "cls_b2": jnp.zeros((), jnp.float32),
        # patch cls head (backbone_config.width assumed == backbone_output_dim)
        "patch_w1": scale * jax.random.normal(ks[2], (D, H), jnp.float32),
        "patch_b1": jnp.zeros((H,), jnp.float32),
        "patch_w2": scale * jax.random.normal(ks[3], (H,), jnp.float32),
        "patch_b2": jnp.zeros((), jnp.float32),
        # fuser: Linear(1 + P, 1); index 0 -> global logit, 1: -> patch logits
        "fuse_w": scale * jax.random.normal(ks[4], (1 + P,), jnp.float32),
        "fuse_b": jnp.zeros((), jnp.float32),
    }


@functools.partial(jax.jit, static_argnames=("use_cls_token", "tb"))
def loupe_classifier_forward(features, pooled_features, params,
                             use_cls_token=True, tb=64):
    """Returns (logits, patch_logits, last_hidden_states). labels path not implemented."""
    # glue: strip cls token in plain JAX (pass-through of features is last_hidden_states)
    patch = features[:, 1:, :] if use_cls_token else features
    B, P, D = patch.shape
    H = params["cls_w1"].shape[1]
    P_out = _round_up(P, 128)          # output-only lane padding (inputs stay unpadded)

    f32, bf16 = jnp.float32, jnp.bfloat16

    # --- batch tile selection: multiple of 16, prefer grid length >= 2 (v7x megacore) ---
    tb = max(16, min(tb, _round_up(B, 16)))
    tb -= tb % 16
    B_pad = _round_up(B, tb)
    if B_pad // tb < 2 and tb >= 32 and tb % 32 == 0:
        tb //= 2
        B_pad = _round_up(B, tb)

    # --- activations: keep real D (no lane padding, no dtype cast) in HBM ---
    pooled_p = pooled_features.astype(f32)
    patch_p = patch.astype(f32)
    if B_pad > B:
        pooled_p = jnp.pad(pooled_p, ((0, B_pad - B), (0, 0)))
        patch_p = jnp.pad(patch_p, ((0, B_pad - B), (0, 0), (0, 0)))

    # --- weights: tiny, pre-cast once; biases / second layers stay f32 ---
    w1g = params["cls_w1"].astype(bf16)                         # (D, H)
    b1g = params["cls_b1"].reshape(1, H).astype(f32)
    w2g = params["cls_w2"].reshape(1, H).astype(f32)
    b2g = params["cls_b2"].reshape(1, 1).astype(f32)
    w1p = params["patch_w1"].astype(bf16)                       # (D, H)
    b1p = params["patch_b1"].reshape(1, H).astype(f32)
    w2p = params["patch_w2"].reshape(1, H).astype(f32)
    b2p = params["patch_b2"].reshape(1, 1).astype(f32)
    wf_g = params["fuse_w"][:1].reshape(1, 1).astype(f32)
    wf_p = jnp.pad(params["fuse_w"][1:], (0, P_out - P)).reshape(1, P_out).astype(f32)
    bf = params["fuse_b"].reshape(1, 1).astype(f32)

    grid = (B_pad // tb,)
    const2 = lambda i: (0, 0)

    in_specs = [
        pl.BlockSpec((tb, D), lambda i: (i, 0)),        # pooled (f32, full-extent D)
        pl.BlockSpec((tb, P, D), lambda i: (i, 0, 0)),  # patches (f32, full-extent P, D)
        pl.BlockSpec((D, H), const2),                   # w1g (resident, bf16)
        pl.BlockSpec((1, H), const2),                   # b1g
        pl.BlockSpec((1, H), const2),                   # w2g row
        pl.BlockSpec((1, 1), const2),                   # b2g
        pl.BlockSpec((D, H), const2),                   # w1p (resident, bf16)
        pl.BlockSpec((1, H), const2),                   # b1p
        pl.BlockSpec((1, H), const2),                   # w2p row
        pl.BlockSpec((1, 1), const2),                   # b2p
        pl.BlockSpec((1, 1), const2),                   # wf_g
        pl.BlockSpec((1, P_out), const2),               # wf_p (lane dense)
        pl.BlockSpec((1, 1), const2),                   # bf
    ]
    out_specs = (
        pl.BlockSpec((tb, 1), lambda i: (i, 0)),        # fused logits
        pl.BlockSpec((tb, P_out), lambda i: (i, 0)),    # patch logits (lane dense)
    )

    flops = (2 * B_pad * P * D * H            # patch head matmul
             + 2 * B_pad * D * H              # global head matmul
             + 2 * B_pad * (P + 1) * H        # lane reductions (2nd layers)
             + 2 * B_pad * P_out)             # fuser
    transcendentals = B_pad * (P + 1) * H     # GELU (real H, no padding)
    bytes_accessed = (B_pad * P * D * 4 + B_pad * D * 4       # f32 activations (one pass)
                      + 2 * D * H * 2 + 6 * H * 4             # weights / biases
                      + B_pad * 4 + B_pad * P_out * 4 + 64)   # outputs + misc

    logits_pad, patch_logits_pad = pl.pallas_call(
        loupe_classifier_kernel,
        out_shape=(
            jax.ShapeDtypeStruct((B_pad, 1), f32),
            jax.ShapeDtypeStruct((B_pad, P_out), f32),
        ),
        grid=grid,
        in_specs=in_specs,
        out_specs=out_specs,
        compiler_params=pltpu.CompilerParams(
            dimension_semantics=("parallel",),        # megacore-shardable on v7x
            vmem_limit_bytes=32 * 1024 * 1024,        # safe on v5e/v6e/v7x scoped VMEM
        ),
        cost_estimate=pl.CostEstimate(
            flops=flops, transcendentals=transcendentals,
            bytes_accessed=bytes_accessed),
    )(pooled_p, patch_p, w1g, b1g, w2g, b2g, w1p, b1p, w2p, b2p, wf_g, wf_p, bf)

    logits = logits_pad[:B]
    # TODO(synk): consumers tolerating the padded (B_pad, P_out) layout could skip this slice.
    patch_logits = patch_logits_pad[:B, :P]
    # last_hidden_states is a pass-through of `features`; loss is None (labels=None).
    return logits, patch_logits, features


def reference_forward(features, pooled_features, params, use_cls_token=True):
    """Pure-JAX reference with the same bf16-matmul / f32-accumulate numerics."""
    patch = features[:, 1:, :] if use_cls_token else features
    bf16 = jnp.bfloat16
    hg = jnp.dot(pooled_features.astype(bf16), params["cls_w1"].astype(bf16),
                 preferred_element_type=jnp.float32)
    hg = _gelu(hg + params["cls_b1"][None, :])
    gl = jnp.sum(hg * params["cls_w2"][None, :], axis=-1, keepdims=True) + params["cls_b2"]
    hp = jnp.einsum("bpd,dh->bph", patch.astype(bf16), params["patch_w1"].astype(bf16),
                    preferred_element_type=jnp.float32)
    hp = _gelu(hp + params["patch_b1"][None, None, :])
    plg = jnp.sum(hp * params["patch_w2"][None, None, :], axis=-1) + params["patch_b2"]
    fused = gl * params["fuse_w"][0] + plg @ params["fuse_w"][1:, None] + params["fuse_b"]
    return fused, plg, features


if __name__ == "__main__":
    B, P, D = 32, 16, 32         # batch, num patches, backbone width (= backbone_output_dim)
    H = D * 2                    # cls_mlp_ratio = 2
    T = P + 1                    # tokens = cls token + patches

    key = jax.random.PRNGKey(0)
    k_feat, k_pool, k_params = jax.random.split(key, 3)
    features = jax.random.normal(k_feat, (B, T, D), jnp.float32)
    pooled_features = jax.random.normal(k_pool, (B, D), jnp.float32)
    params = init_params(k_params, D, H, P)

    logits, patch_logits, last_hidden = loupe_classifier_forward(
        features, pooled_features, params, use_cls_token=True)
    jax.block_until_ready((logits, patch_logits, last_hidden))

    ref_logits, ref_patch_logits, _ = reference_forward(
        features, pooled_features, params, use_cls_token=True)

    assert logits.shape == (B, 1)
    assert patch_logits.shape == (B, P)
    assert last_hidden.shape == (B, T, D)
    assert jnp.allclose(logits, ref_logits, atol=2e-4, rtol=2e-3), \
        float(jnp.max(jnp.abs(logits - ref_logits)))
    assert jnp.allclose(patch_logits, ref_patch_logits, atol=2e-4, rtol=2e-3), \
        float(jnp.max(jnp.abs(patch_logits - ref_patch_logits)))

    print("KERNEL_OK")
</pallas_src>

<mosaic_0001>
module attributes {stable_mosaic.version = 11 : i64} {
  func.func @loupe_classifier_kernel(%arg0: i32, %arg1: memref<16x32xf32, #tpu.memory_space<vmem>>, %arg2: memref<16x16x32xf32, #tpu.memory_space<vmem>>, %arg3: memref<32x64xbf16, #tpu.memory_space<vmem>>, %arg4: memref<1x64xf32, #tpu.memory_space<vmem>>, %arg5: memref<1x64xf32, #tpu.memory_space<vmem>>, %arg6: memref<1x1xf32, #tpu.memory_space<vmem>>, %arg7: memref<32x64xbf16, #tpu.memory_space<vmem>>, %arg8: memref<1x64xf32, #tpu.memory_space<vmem>>, %arg9: memref<1x64xf32, #tpu.memory_space<vmem>>, %arg10: memref<1x1xf32, #tpu.memory_space<vmem>>, %arg11: memref<1x1xf32, #tpu.memory_space<vmem>>, %arg12: memref<1x128xf32, #tpu.memory_space<vmem>>, %arg13: memref<1x1xf32, #tpu.memory_space<vmem>>, %arg14: memref<16x1xf32, #tpu.memory_space<vmem>>, %arg15: memref<16x128xf32, #tpu.memory_space<vmem>>) attributes {dimension_semantics = [#tpu.dimension_semantics<parallel>], iteration_bounds = array<i64: 2>, scalar_prefetch = 0 : i64, scratch_operands = 0 : i64, tpu.core_type = #tpu.core_type<tc>, window_params = [{transform_indices = @transform_0, window_bounds = array<i64: 16, 32>}, {transform_indices = @transform_1, window_bounds = array<i64: 16, 16, 32>}, {pipeline_mode = #tpu.pipeline_mode<synchronous>, transform_indices = @transform_2, window_bounds = array<i64: 32, 64>}, {pipeline_mode = #tpu.pipeline_mode<synchronous>, transform_indices = @transform_3, window_bounds = array<i64: 1, 64>}, {pipeline_mode = #tpu.pipeline_mode<synchronous>, transform_indices = @transform_4, window_bounds = array<i64: 1, 64>}, {pipeline_mode = #tpu.pipeline_mode<synchronous>, transform_indices = @transform_5, window_bounds = array<i64: 1, 1>}, {pipeline_mode = #tpu.pipeline_mode<synchronous>, transform_indices = @transform_6, window_bounds = array<i64: 32, 64>}, {pipeline_mode = #tpu.pipeline_mode<synchronous>, transform_indices = @transform_7, window_bounds = array<i64: 1, 64>}, {pipeline_mode = #tpu.pipeline_mode<synchronous>, transform_indices = @transform_8, window_bounds = array<i64: 1, 64>}, {pipeline_mode = #tpu.pipeline_mode<synchronous>, transform_indices = @transform_9, window_bounds = array<i64: 1, 1>}, {pipeline_mode = #tpu.pipeline_mode<synchronous>, transform_indices = @transform_10, window_bounds = array<i64: 1, 1>}, {pipeline_mode = #tpu.pipeline_mode<synchronous>, transform_indices = @transform_11, window_bounds = array<i64: 1, 128>}, {pipeline_mode = #tpu.pipeline_mode<synchronous>, transform_indices = @transform_12, window_bounds = array<i64: 1, 1>}, {transform_indices = @transform_13, window_bounds = array<i64: 16, 1>}, {transform_indices = @transform_14, window_bounds = array<i64: 16, 128>}]} {
    %c0 = arith.constant 0 : index
    %c0_0 = arith.constant 0 : index
    %0 = vector.load %arg1[%c0, %c0_0] : memref<16x32xf32, #tpu.memory_space<vmem>>, vector<16x32xf32>
    %1 = arith.truncf %0 : vector<16x32xf32> to vector<16x32xbf16>
    %c0_1 = arith.constant 0 : index
    %c0_2 = arith.constant 0 : index
    %2 = vector.load %arg3[%c0_1, %c0_2] : memref<32x64xbf16, #tpu.memory_space<vmem>>, vector<32x64xbf16>
    %cst = arith.constant dense<0.000000e+00> : vector<16x64xf32>
    %3 = tpu.matmul %1, %2, %cst {dimension_numbers = #tpu.dot_dimension_numbers<[1], [0], [0], [1], [0, 0, 1, 1], [], []>} : vector<16x32xbf16>, vector<32x64xbf16>, vector<16x64xf32> -> vector<16x64xf32>
    %c0_3 = arith.constant 0 : index
    %c0_4 = arith.constant 0 : index
    %4 = vector.load %arg4[%c0_3, %c0_4] : memref<1x64xf32, #tpu.memory_space<vmem>>, vector<1x64xf32>
    %5 = vector.broadcast %4 : vector<1x64xf32> to vector<16x64xf32>
    %6 = arith.addf %3, %5 : vector<16x64xf32>
    %7 = arith.mulf %6, %6 : vector<16x64xf32>
    %8 = arith.mulf %6, %7 : vector<16x64xf32>
    %cst_5 = arith.constant 4.471500e-02 : f32
    %9 = vector.broadcast %cst_5 : f32 to vector<16x64xf32>
    %10 = arith.mulf %9, %8 : vector<16x64xf32>
    %11 = arith.addf %6, %10 : vector<16x64xf32>
    %cst_6 = arith.constant 0.797884583 : f32
    %12 = vector.broadcast %cst_6 : f32 to vector<16x64xf32>
    %13 = arith.mulf %12, %11 : vector<16x64xf32>
    %14 = math.tanh %13 : vector<16x64xf32>
    %cst_7 = arith.constant 1.000000e+00 : f32
    %15 = vector.broadcast %cst_7 : f32 to vector<16x64xf32>
    %16 = arith.addf %15, %14 : vector<16x64xf32>
    %cst_8 = arith.constant 5.000000e-01 : f32
    %17 = vector.broadcast %cst_8 : f32 to vector<16x64xf32>
    %18 = arith.mulf %17, %16 : vector<16x64xf32>
    %19 = arith.mulf %6, %18 : vector<16x64xf32>
    %c0_9 = arith.constant 0 : index
    %c0_10 = arith.constant 0 : index
    %20 = vector.load %arg5[%c0_9, %c0_10] : memref<1x64xf32, #tpu.memory_space<vmem>>, vector<1x64xf32>
    %21 = vector.broadcast %20 : vector<1x64xf32> to vector<16x64xf32>
    %22 = arith.mulf %19, %21 : vector<16x64xf32>
    %cst_11 = arith.constant dense<0.000000e+00> : vector<16xf32>
    %23 = vector.multi_reduction <add>, %22, %cst_11 [1] : vector<16x64xf32> to vector<16xf32>
    %24 = vector.shape_cast %23 : vector<16xf32> to vector<16x1xf32>
    %c0_12 = arith.constant 0 : index
    %c0_13 = arith.constant 0 : index
    %25 = vector.load %arg6[%c0_12, %c0_13] : memref<1x1xf32, #tpu.memory_space<vmem>>, vector<1x1xf32>
    %26 = vector.broadcast %25 : vector<1x1xf32> to vector<16x1xf32>
    %27 = arith.addf %24, %26 : vector<16x1xf32>
    %c0_14 = arith.constant 0 : index
    %c0_15 = arith.constant 0 : index
    %c0_16 = arith.constant 0 : index
    %28 = vector.load %arg2[%c0_14, %c0_15, %c0_16] : memref<16x16x32xf32, #tpu.memory_space<vmem>>, vector<16x16x32xf32>
    %29 = vector.shape_cast %28 : vector<16x16x32xf32> to vector<256x32xf32>
    %30 = arith.truncf %29 : vector<256x32xf32> to vector<256x32xbf16>
    %c0_17 = arith.constant 0 : index
    %c0_18 = arith.constant 0 : index
    %31 = vector.load %arg7[%c0_17, %c0_18] : memref<32x64xbf16, #tpu.memory_space<vmem>>, vector<32x64xbf16>
    %cst_19 = arith.constant dense<0.000000e+00> : vector<256x64xf32>
    %32 = tpu.matmul %30, %31, %cst_19 {dimension_numbers = #tpu.dot_dimension_numbers<[1], [0], [0], [1], [0, 0, 1, 1], [], []>} : vector<256x32xbf16>, vector<32x64xbf16>, vector<256x64xf32> -> vector<256x64xf32>
    %c0_20 = arith.constant 0 : index
    %c0_21 = arith.constant 0 : index
    %33 = vector.load %arg8[%c0_20, %c0_21] : memref<1x64xf32, #tpu.memory_space<vmem>>, vector<1x64xf32>
    %34 = vector.broadcast %33 : vector<1x64xf32> to vector<256x64xf32>
    %35 = arith.addf %32, %34 : vector<256x64xf32>
    %36 = arith.mulf %35, %35 : vector<256x64xf32>
    %37 = arith.mulf %35, %36 : vector<256x64xf32>
    %cst_22 = arith.constant 4.471500e-02 : f32
    %38 = vector.broadcast %cst_22 : f32 to vector<256x64xf32>
    %39 = arith.mulf %38, %37 : vector<256x64xf32>
    %40 = arith.addf %35, %39 : vector<256x64xf32>
    %cst_23 = arith.constant 0.797884583 : f32
    %41 = vector.broadcast %cst_23 : f32 to vector<256x64xf32>
    %42 = arith.mulf %41, %40 : vector<256x64xf32>
    %43 = math.tanh %42 : vector<256x64xf32>
    %cst_24 = arith.constant 1.000000e+00 : f32
    %44 = vector.broadcast %cst_24 : f32 to vector<256x64xf32>
    %45 = arith.addf %44, %43 : vector<256x64xf32>
    %cst_25 = arith.constant 5.000000e-01 : f32
    %46 = vector.broadcast %cst_25 : f32 to vector<256x64xf32>
    %47 = arith.mulf %46, %45 : vector<256x64xf32>
    %48 = arith.mulf %35, %47 : vector<256x64xf32>
    %49 = vector.shape_cast %48 : vector<256x64xf32> to vector<16x16x64xf32>
    %c0_26 = arith.constant 0 : index
    %c0_27 = arith.constant 0 : index
    %50 = vector.load %arg9[%c0_26, %c0_27] : memref<1x64xf32, #tpu.memory_space<vmem>>, vector<1x64xf32>
    %51 = vector.shape_cast %50 : vector<1x64xf32> to vector<1x1x64xf32>
    %52 = vector.broadcast %51 : vector<1x1x64xf32> to vector<16x16x64xf32>
    %53 = arith.mulf %49, %52 : vector<16x16x64xf32>
    %cst_28 = arith.constant dense<0.000000e+00> : vector<16x16xf32>
    %54 = vector.multi_reduction <add>, %53, %cst_28 [2] : vector<16x16x64xf32> to vector<16x16xf32>
    %c0_29 = arith.constant 0 : index
    %c0_30 = arith.constant 0 : index
    %55 = vector.load %arg10[%c0_29, %c0_30] : memref<1x1xf32, #tpu.memory_space<vmem>>, vector<1x1xf32>
    %56 = vector.broadcast %55 : vector<1x1xf32> to vector<16x16xf32>
    %57 = arith.addf %54, %56 : vector<16x16xf32>
    %cst_31 = arith.constant 0.000000e+00 : f32
    %58 = vector.broadcast %cst_31 : f32 to vector<16x112xf32>
    %59 = tpu.concatenate %57, %58 in 1 : vector<16x16xf32>, vector<16x112xf32> -> vector<16x128xf32>
    %c0_32 = arith.constant 0 : index
    %c0_33 = arith.constant 0 : index
    %60 = vector.load %arg11[%c0_32, %c0_33] : memref<1x1xf32, #tpu.memory_space<vmem>>, vector<1x1xf32>
    %61 = vector.broadcast %60 : vector<1x1xf32> to vector<16x1xf32>
    %62 = arith.mulf %27, %61 : vector<16x1xf32>
    %c0_34 = arith.constant 0 : index
    %c0_35 = arith.constant 0 : index
    %63 = vector.load %arg12[%c0_34, %c0_35] : memref<1x128xf32, #tpu.memory_space<vmem>>, vector<1x128xf32>
    %64 = vector.broadcast %63 : vector<1x128xf32> to vector<16x128xf32>
    %65 = arith.mulf %59, %64 : vector<16x128xf32>
    %cst_36 = arith.constant dense<0.000000e+00> : vector<16xf32>
    %66 = vector.multi_reduction <add>, %65, %cst_36 [1] : vector<16x128xf32> to vector<16xf32>
    %67 = vector.shape_cast %66 : vector<16xf32> to vector<16x1xf32>
    %68 = arith.addf %62, %67 : vector<16x1xf32>
    %c0_37 = arith.constant 0 : index
    %c0_38 = arith.constant 0 : index
    %69 = vector.load %arg13[%c0_37, %c0_38] : memref<1x1xf32, #tpu.memory_space<vmem>>, vector<1x1xf32>
    %70 = vector.broadcast %69 : vector<1x1xf32> to vector<16x1xf32>
    %71 = arith.addf %68, %70 : vector<16x1xf32>
    %c0_39 = arith.constant 0 : index
    %c0_40 = arith.constant 0 : index
    %72 = vector.load %arg14[%c0_39, %c0_40] : memref<16x1xf32, #tpu.memory_space<vmem>>, vector<16x1xf32>
    tpu.vector_store %arg14[%c0_39, %c0_40], %71 {strides = array<i32>} : memref<16x1xf32, #tpu.memory_space<vmem>>, vector<16x1xf32>,
    %c0_41 = arith.constant 0 : index
    %c0_42 = arith.constant 0 : index
    %73 = vector.load %arg15[%c0_41, %c0_42] : memref<16x128xf32, #tpu.memory_space<vmem>>, vector<16x128xf32>
    tpu.vector_store %arg15[%c0_41, %c0_42], %59 {strides = array<i32>} : memref<16x128xf32, #tpu.memory_space<vmem>>, vector<16x128xf32>,
    return
  }
  func.func @transform_0(%arg0: i32) -> (i32, i32) {
    %c0_i32 = arith.constant 0 : i32
    %c0_i32_0 = arith.constant 0 : i32
    return %arg0, %c0_i32 : i32, i32
  }
  func.func @transform_1(%arg0: i32) -> (i32, i32, i32) {
    %c0_i32 = arith.constant 0 : i32
    %c0_i32_0 = arith.constant 0 : i32
    %c0_i32_1 = arith.constant 0 : i32
    return %arg0, %c0_i32, %c0_i32_0 : i32, i32, i32
  }
  func.func @transform_2(%arg0: i32) -> (i32, i32) {
    %c0_i32 = arith.constant 0 : i32
    %c0_i32_0 = arith.constant 0 : i32
    %c0_i32_1 = arith.constant 0 : i32
    return %c0_i32, %c0_i32_0 : i32, i32
  }
  func.func @transform_3(%arg0: i32) -> (i32, i32) {
    %c0_i32 = arith.constant 0 : i32
    %c0_i32_0 = arith.constant 0 : i32
    %c0_i32_1 = arith.constant 0 : i32
    return %c0_i32, %c0_i32_0 : i32, i32
  }
  func.func @transform_4(%arg0: i32) -> (i32, i32) {
    %c0_i32 = arith.constant 0 : i32
    %c0_i32_0 = arith.constant 0 : i32
    %c0_i32_1 = arith.constant 0 : i32
    return %c0_i32, %c0_i32_0 : i32, i32
  }
  func.func @transform_5(%arg0: i32) -> (i32, i32) {
    %c0_i32 = arith.constant 0 : i32
    %c0_i32_0 = arith.constant 0 : i32
    %c0_i32_1 = arith.constant 0 : i32
    return %c0_i32, %c0_i32_0 : i32, i32
  }
  func.func @transform_6(%arg0: i32) -> (i32, i32) {
    %c0_i32 = arith.constant 0 : i32
    %c0_i32_0 = arith.constant 0 : i32
    %c0_i32_1 = arith.constant 0 : i32
    return %c0_i32, %c0_i32_0 : i32, i32
  }
  func.func @transform_7(%arg0: i32) -> (i32, i32) {
    %c0_i32 = arith.constant 0 : i32
    %c0_i32_0 = arith.constant 0 : i32
    %c0_i32_1 = arith.constant 0 : i32
    return %c0_i32, %c0_i32_0 : i32, i32
  }
  func.func @transform_8(%arg0: i32) -> (i32, i32) {
    %c0_i32 = arith.constant 0 : i32
    %c0_i32_0 = arith.constant 0 : i32
    %c0_i32_1 = arith.constant 0 : i32
    return %c0_i32, %c0_i32_0 : i32, i32
  }
  func.func @transform_9(%arg0: i32) -> (i32, i32) {
    %c0_i32 = arith.constant 0 : i32
    %c0_i32_0 = arith.constant 0 : i32
    %c0_i32_1 = arith.constant 0 : i32
    return %c0_i32, %c0_i32_0 : i32, i32
  }
  func.func @transform_10(%arg0: i32) -> (i32, i32) {
    %c0_i32 = arith.constant 0 : i32
    %c0_i32_0 = arith.constant 0 : i32
    %c0_i32_1 = arith.constant 0 : i32
    return %c0_i32, %c0_i32_0 : i32, i32
  }
  func.func @transform_11(%arg0: i32) -> (i32, i32) {
    %c0_i32 = arith.constant 0 : i32
    %c0_i32_0 = arith.constant 0 : i32
    %c0_i32_1 = arith.constant 0 : i32
    return %c0_i32, %c0_i32_0 : i32, i32
  }
  func.func @transform_12(%arg0: i32) -> (i32, i32) {
    %c0_i32 = arith.constant 0 : i32
    %c0_i32_0 = arith.constant 0 : i32
    %c0_i32_1 = arith.constant 0 : i32
    return %c0_i32, %c0_i32_0 : i32, i32
  }
  func.func @transform_13(%arg0: i32) -> (i32, i32) {
    %c0_i32 = arith.constant 0 : i32
    %c0_i32_0 = arith.constant 0 : i32
    return %arg0, %c0_i32 : i32, i32
  }
  func.func @transform_14(%arg0: i32) -> (i32, i32) {
    %c0_i32 = arith.constant 0 : i32
    %c0_i32_0 = arith.constant 0 : i32
    return %arg0, %c0_i32 : i32, i32
  }
}

</mosaic_0001>

<bundles_post_ra>
// kernel: loupe_classifier_forward.1
= control target key start
LH: loop header
LB: loop body
LE: loop exit
PB: predicated region body
PF: predicated region fallthrough
CT: control target
= control target key end

     0   :  { %s2022_s21 = smov 0   ;;  %s2739_s0 = inlined_call_operand.vmem [shape: f32[32,32], index: 0, kind: input, shape index: {}]   ;;  %s2740_s1 = inlined_call_operand.vmem [shape: f32[32,16,32], index: 1, kind: input, shape index: {}]   ;;  %s2741_s2 = inlined_call_operand.vmem [shape: bf16[32,64], index: 2, kind: input, shape index: {}]   ;;  %s2742_s3 = inlined_call_operand.vmem [shape: f32[1,64], index: 3, kind: input, shape index: {}]   ;;  %s2743_s4 = inlined_call_operand.vmem [shape: f32[1,64], index: 4, kind: input, shape index: {}]   ;;  %s2744_s5 = inlined_call_operand.<no memory space> [shape: f32[1,1], index: 5, kind: input, shape index: {}]   ;;  %s2745_s6 = inlined_call_operand.vmem [shape: bf16[32,64], index: 6, kind: input, shape index: {}]   ;;  %s2746_s7 = inlined_call_operand.vmem [shape: f32[1,64], index: 7, kind: input, shape index: {}]   ;;  %s2747_s8 = inlined_call_operand.vmem [shape: f32[1,64], index: 8, kind: input, shape index: {}]   ;;  %s2748_s11 = inlined_call_operand.vmem [shape: f32[1,128], index: 11, kind: input, shape index: {}]   ;;  %s2749_s13 = inlined_call_operand.vmem [shape: f32[32,1], index: 13, kind: output, shape index: {0}]   ;;  %s2750_s14 = inlined_call_operand.vmem [shape: f32[32,128], index: 14, kind: output, shape index: {1}]   ;;  %s2751_s9 = inlined_call_operand.<no memory space> [shape: f32[1,1], index: 9, kind: input, shape index: {}]   ;;  %s2752_s10 = inlined_call_operand.<no memory space> [shape: f32[1,1], index: 10, kind: input, shape index: {}]   ;;  %s2753_s12 = inlined_call_operand.<no memory space> [shape: f32[1,1], index: 12, kind: input, shape index: {}]  }
   0x1   :  { %v20_v0 = vstv %s2744_s5  ;;  %v22_v1 = vstv %s2751_s9  ;;  %v24_v2 = vstv %s2752_s10  ;;  %v26_v3 = vstv %s2753_s12 }
   0x2   :  { %21 = vst [vmem:[#allocation2] sm:$0x1] %v20_v0  ;;  %23 = vst [vmem:[#allocation3] sm:$0x1] %v22_v1 }
   0x3   :  { %25 = vst [vmem:[#allocation4] sm:$0x1] %v24_v2  ;;  %27 = vst [vmem:[#allocation5] sm:$0x1] %v26_v3 }
   0x4 LB: > { %s1724_s5 = sadd.s32 4294967295, %s1930_s21   ;;  %p1728_p0 = scmp.ge.s32.totalorder %s1930_s21, 1  ;;  %s1930_s21 = sphi %s2022_s21, %s33_s21  }
   0x5   : > { %p436_p1 = scmp.lt.s32.totalorder %s1930_s21, 3 }
   0x7   : > { %p437_p2 = pnand %p1728_p0, %p436_p1 }
   0x9   : > { %440 = sbr.rel (%p437_p2) target bundleno = 684 (0x2ac), region = 72 }
  0x10   : > { %v1852_v4 = vld [vmem:[%s2741_s2] sm:$0xff]   ;;  %v1932_v5 = vmov 0.0   ;;  %v1854_v7 = vld [vmem:[%s2741_s2 + $0x8] sm:$0xff]   ;;  %vm1933_vm0 = vmmov 0   ;;  %s1729_s25 = sshll.u32 %s1724_s5, 1  ;;  %s1731_s28 = sshll.u32 %s1724_s5, 4 }
  0x11   : > { %1792 = vmatprep.subr.bf16.mxu0 %v1932_v5  ;;  %v1853_v6 = vld [vmem:[%s2745_s6] sm:$0xff]   ;;  %1796 = vmatprep.mubr.msk.bf16.mxu0 %vm1933_vm0, %v1932_v5  ;;  %v1855_v8 = vld [vmem:[%s2745_s6 + $0x8] sm:$0xff]   ;;  %p494_p3 = scmp.lt.s32.totalorder %s1729_s25, 3  ;;  %p500_p4 = scmp.lt.s32.totalorder %s1731_s28, 31  ;;  %vm545_vm1 = vcmask 261120   ;;  %vm617_vm2 = vcmask 523264  }
  0x12   : > { %1793 = vmatpush3.bf16.msra.mxu0 %v1852_v4  ;;  %1836 = vmatprep.subr.bf16.mxu1 %v1853_v6  ;;  %v1738_v61 = vld [vmem:[%s2742_s3] ss:$0 sm:$0xff]  ;;  %vm1421_vm3 = vcmask 130112   ;;  %vm1558_vm4 = vcmask 1041409   ;;  %vm1560_vm5 = vcmask 1042434   ;;  %vm1562_vm6 = vcmask 1043459  }
  0x13   : > { %1794 = vmatprep.subr.bf16.mxu0 %v1932_v5  ;;  %1838 = vmatpush3.bf16.msra.mxu1 %v1853_v6  ;;  %s2780_s25 = smov (!%p494_p3, %s1729_s25), 3  ;;  %s2782_s28 = smov (!%p500_p4, %s1731_s28), 31  ;;  %v2110_v4 = vld [vmem:[%s2746_s7] ss:$0 sm:$0xff]  ;;  %vm1564_vm7 = vcmask 1044484   ;;  %vm1566_vm8 = vcmask 1045509  }
  0x14   : > { %1837 = vmatprep.subr.bf16.mxu1 %v1855_v8  ;;  %s2042_s29 = sshll.u32 %s2780_s25, 3  ;;  %s1770_s17 = sshll.u32 %s2782_s28, 4  ;;  %vm1568_vm9 = vcmask 1046534   ;;  %vm1570_vm10 = vcmask 1047559   ;;  %vm1581_vm11 = vcmask 130048   ;;  %vm1617_vm12 = vcmask 7168  }
  0x15   : > { %s497_s16 = scalar_lea.vmem %s2739_s0, %s2042_s29  ;;  %s2052_s20 = scalar_lea.vmem %s2740_s1, %s1770_s17 }
  0x16   : > { %1795 = vmatpush3.bf16.msra.mxu0 %v1854_v7  ;;  %v519_v9 = vld [vmem:[%s497_s16] sm:$0xff]  ;;  %v520_v10 = vld [vmem:[%s497_s16 + $0x8] sm:$0xff]  ;;  %v647_v14 = vld [vmem:[%s2052_s20 + $0x70] sm:$0xff]  ;;  %s2673_s28 = scalar_lea.vmem %s2750_s14, %s2042_s29  ;;  %s510_s18 = scalar_lea.vmem %s2749_s13, %s2042_s29 }
  0x17   : > { %1800 = vmatprep.subr.bf16.mxu0 %v1853_v6  ;;  %1839 = vmatpush3.bf16.msra.mxu1 %v1855_v8  ;;  %v521_v11 = vpack.c.bf16 %v520_v10, %v519_v9  ;;  %v645_v12 = vld [vmem:[%s2052_s20 + $0x60] sm:$0xff]  ;;  %v646_v13 = vld [vmem:[%s2052_s20 + $0x68] sm:$0xff]  ;;  %v648_v16 = vld [vmem:[%s2052_s20 + $0x78] sm:$0xff] }
  0x18   : > { %v671_v15 = vpack.c.bf16 %v646_v13, %v645_v12  ;;  %v633_v17 = vld [vmem:[%s2052_s20] sm:$0xff]  ;;  %v634_v18 = vld [vmem:[%s2052_s20 + $0x8] sm:$0xff]  ;;  %v672_v19 = vpack.c.bf16 %v648_v16, %v647_v14  ;;  %v635_v21 = vld [vmem:[%s2052_s20 + $0x10] sm:$0xff] }
  0x19   : > { %1797 = vmatmul.mubr.msk.bf16.vlgmr.msra.gmra.mrb[0].mxu0 %vm545_vm1, %v521_v11  ;;  %v665_v20 = vpack.c.bf16 %v634_v18, %v633_v17  ;;  %v636_v22 = vld [vmem:[%s2052_s20 + $0x18] sm:$0xff]  ;;  %v649_v23 = vld [vmem:[%s2052_s20 + $0x80] sm:$0xff]  ;;  %v650_v25 = vld [vmem:[%s2052_s20 + $0x88] sm:$0xff] }
  0x1a   : > { %1801 = vmatpush3.bf16.msra.mxu0 %v1853_v6  ;;  %1816 = vmatprep.mubr.msk.bf16.mxu1 %vm545_vm1, %v671_v15  ;;  %v666_v24 = vpack.c.bf16 %v636_v22, %v635_v21  ;;  %v673_v26 = vpack.c.bf16 %v650_v25, %v649_v23  ;;  %v637_v27 = vld [vmem:[%s2052_s20 + $0x20] sm:$0xff]  ;;  %v638_v28 = vld [vmem:[%s2052_s20 + $0x28] sm:$0xff]  ;;  %v651_v29 = vld [vmem:[%s2052_s20 + $0x90] sm:$0xff] }
  0x1b   : > { %1802 = vmatprep.subr.bf16.mxu0 %v1855_v8  ;;  %1817 = vmatmul.mubr.msk.bf16.vlgmr.msra.gmra.mrb[0].mxu1 %vm545_vm1, %v672_v19  ;;  %v652_v30 = vld [vmem:[%s2052_s20 + $0x98] sm:$0xff]  ;;  %v667_v31 = vpack.c.bf16 %v638_v28, %v637_v27  ;;  %v653_v32 = vld [vmem:[%s2052_s20 + $0xa0] sm:$0xff]  ;;  %v654_v33 = vld [vmem:[%s2052_s20 + $0xa8] sm:$0xff] }
  0x1c   : > { %1804 = vmatprep.mubr.msk.bf16.mxu0 %vm545_vm1, %v665_v20  ;;  %1820 = vmatprep.mubr.msk.bf16.mxu1 %vm545_vm1, %v673_v26  ;;  %v674_v34 = vpack.c.bf16 %v652_v30, %v651_v29  ;;  %v639_v35 = vld [vmem:[%s2052_s20 + $0x30] sm:$0xff]  ;;  %v640_v36 = vld [vmem:[%s2052_s20 + $0x38] sm:$0xff]  ;;  %v675_v37 = vpack.c.bf16 %v654_v33, %v653_v32  ;;  %v641_v38 = vld [vmem:[%s2052_s20 + $0x40] sm:$0xff] }
  0x1d   : > { %v642_v39 = vld [vmem:[%s2052_s20 + $0x48] sm:$0xff]  ;;  %v668_v40 = vpack.c.bf16 %v640_v36, %v639_v35  ;;  %v655_v42 = vld [vmem:[%s2052_s20 + $0xb0] sm:$0xff]  ;;  %v656_v43 = vld [vmem:[%s2052_s20 + $0xb8] sm:$0xff] }
  0x1e   : > { %1803 = vmatpush3.bf16.msra.mxu0 %v1855_v8  ;;  %v669_v41 = vpack.c.bf16 %v642_v39, %v641_v38  ;;  %v657_v44 = vld [vmem:[%s2052_s20 + $0xc0] sm:$0xff]  ;;  %v658_v45 = vld [vmem:[%s2052_s20 + $0xc8] sm:$0xff]  ;;  %v676_v46 = vpack.c.bf16 %v656_v43, %v655_v42  ;;  %v643_v47 = vld [vmem:[%s2052_s20 + $0x50] sm:$0xff] }
  0x1f   : > { %v644_v48 = vld [vmem:[%s2052_s20 + $0x58] sm:$0xff]  ;;  %v677_v49 = vpack.c.bf16 %v658_v45, %v657_v44  ;;  %v659_v51 = vld [vmem:[%s2052_s20 + $0xd0] sm:$0xff]  ;;  %v661_v53 = vld [vmem:[%s2052_s20 + $0xe0] sm:$0xff] }
  0x20   : > { %v670_v50 = vpack.c.bf16 %v644_v48, %v643_v47  ;;  %v660_v52 = vld [vmem:[%s2052_s20 + $0xd8] sm:$0xff]  ;;  %v662_v54 = vld [vmem:[%s2052_s20 + $0xe8] sm:$0xff]  ;;  %v663_v57 = vld [vmem:[%s2052_s20 + $0xf0] sm:$0xff] }
  0x21   : > { %1805 = vmatmul.mubr.msk.bf16.vlgmr.msra.gmra.mrb[4].mxu0 %vm545_vm1, %v666_v24  ;;  %v678_v55 = vpack.c.bf16 %v660_v52, %v659_v51  ;;  %v679_v56 = vpack.c.bf16 %v662_v54, %v661_v53  ;;  %v664_v58 = vld [vmem:[%s2052_s20 + $0xf8] sm:$0xff] }
  0x22   : > { %1808 = vmatprep.mubr.msk.bf16.mxu0 %vm545_vm1, %v667_v31  ;;  %v680_v59 = vpack.c.bf16 %v664_v58, %v663_v57 }
  0x23   : > { %1821 = vmatmul.mubr.msk.bf16.gmra.mrb[4].mxu1 %vm545_vm1, %v674_v34 }
  0x24   : > { %1824 = vmatprep.mubr.msk.bf16.mxu1 %vm545_vm1, %v675_v37 }
  0x29   : > { %1809 = vmatmul.mubr.msk.bf16.gmra.mrb[8].mxu0 %vm545_vm1, %v668_v40 }
  0x2a   : > { %1812 = vmatprep.mubr.msk.bf16.mxu0 %vm545_vm1, %v669_v41 }
  0x2b   : > { %1825 = vmatmul.mubr.msk.bf16.gmra.mrb[8].mxu1 %vm545_vm1, %v676_v46 }
  0x2c   : > { %1828 = vmatprep.mubr.msk.bf16.mxu1 %vm545_vm1, %v677_v49 }
  0x31   : > { %1813 = vmatmul.mubr.msk.bf16.gmra.mrb[12].mxu0 %vm545_vm1, %v670_v50 }
  0x33   : > { %1829 = vmatmul.mubr.msk.bf16.gmra.mrb[12].mxu1 %vm545_vm1, %v678_v55 }
  0x34   : > { %1832 = vmatprep.mubr.msk.bf16.mxu1 %vm545_vm1, %v679_v56 }
  0x3b   : > { %1833 = vmatmul.mubr.msk.bf16.gmra.mrb[16].mxu1 %vm545_vm1, %v680_v59 }
  0xec   : > { %v583_v60 = vpop.f32.mrb[0].mxu0 }
  0xed   : > { %v1798_v62 = vpop.f32.mrb[1].mxu0  ;;  %v2105_v1 = vadd.f32 %v1738_v61, %v583_v60 }
  0xee   : > { %v586_v63 = vpop.f32.mrb[2].mxu0  ;;  %v1818_v2 = vpop.f32.mrb[0].mxu1 }
  0xef   : > { %v1799_v0 = vpop.f32.mrb[3].mxu0  ;;  %2761 = vst [vmem:[#allocation6_spill] sm:$0xff] %v2105_v1  ;;  %v834_v3 = vpop.f32.mrb[1].mxu1  ;;  %v590_v6 = vmul.f32 %v2105_v1, %v2105_v1  ;;  %v2114_v7 = vadd.f32 %v1738_v61, %v586_v63  ;;  %v2126_v17 = vadd.f32 %v1818_v2, %v2110_v4 }
  0xf0   : > { %v1819_v5 = vpop.f32.mrb[2].mxu1  ;;  %v2117_v11 = vadd.f32 %v2110_v4, %v834_v3 }
  0xf1   : > { %2762 = vst [vmem:[#allocation7_spill] sm:$0xff] %v2114_v7  ;;  %v837_v8 = vpop.f32.mrb[3].mxu1  ;;  %v592_v15 = vmul.f32 %v590_v6, %v2105_v1  ;;  %v591_v16 = vmul.f32 %v2114_v7, %v2114_v7  ;;  %v927_v27 = vmul.f32 %v2126_v17, %v2126_v17  ;;  %v2145_v32 = vadd.f32 %v1819_v5, %v2110_v4 }
  0xf2   : > { %v2120_v13 = vadd.f32 %v2110_v4, %v837_v8  ;;  %v925_v20 = vmul.f32 %v2117_v11, %v2117_v11 }
  0xf3   : > { %v594_v25 = vmul.f32 0.044715, %v592_v15  ;;  %v593_v26 = vmul.f32 %v591_v16, %v2114_v7  ;;  %v959_v41 = vmul.f32 %v927_v27, %v2126_v17  ;;  %v928_v46 = vmul.f32 %v2145_v32, %v2145_v32 }
  0xf4   : > { %v1806_v9 = vpop.f32.mrb[4].mxu0  ;;  %v926_v23 = vmul.f32 %v2120_v13, %v2120_v13  ;;  %v957_v31 = vmul.f32 %v925_v20, %v2117_v11 }
  0xf5   : > { %v786_v10 = vpop.f32.mrb[5].mxu0  ;;  %v2129_v18 = vadd.f32 %v1806_v9, %v2110_v4  ;;  %v596_v38 = vadd.f32 %v594_v25, %v2105_v1  ;;  %v595_v39 = vmul.f32 0.044715, %v593_v26  ;;  %v991_v57 = vmul.f32 0.044715, %v959_v41 }
  0xf6   : > { %v1807_v12 = vpop.f32.mrb[6].mxu0  ;;  %v1822_v19 = vpop.f32.mrb[4].mxu1  ;;  %v2134_v21 = vadd.f32 %v2110_v4, %v786_v10  ;;  %v958_v35 = vmul.f32 %v926_v23, %v2120_v13  ;;  %v989_v45 = vmul.f32 0.044715, %v957_v31  ;;  %v960_v63 = vmul.f32 %v928_v46, %v2145_v32 }
  0xf7   : > { %v789_v14 = vpop.f32.mrb[7].mxu0  ;;  %v850_v22 = vpop.f32.mrb[5].mxu1  ;;  %v915_v28 = vmul.f32 %v2129_v18, %v2129_v18  ;;  %v2151_v36 = vadd.f32 %v1822_v19, %v2110_v4  ;;  %v2161_v43 = vadd.f32 %v1807_v12, %v2110_v4  ;;  %v598_v52 = vmul.f32 0.7978846, %v596_v38 }
  0xf8   : > { %v1823_v24 = vpop.f32.mrb[6].mxu1  ;;  %v913_v33 = vmul.f32 %v2134_v21, %v2134_v21  ;;  %v990_v49 = vmul.f32 0.044715, %v958_v35  ;;  %v597_v53 = vadd.f32 %v595_v39, %v2114_v7  ;;  %v2172_v54 = vadd.f32 %v2110_v4, %v850_v22 }
  0xf9   : > { %v853_v29 = vpop.f32.mrb[7].mxu1  ;;  %v947_v42 = vmul.f32 %v915_v28, %v2129_v18  ;;  %v931_v50 = vmul.f32 %v2151_v36, %v2151_v36  ;;  %v916_v59 = vmul.f32 %v2161_v43, %v2161_v43  ;;  %v2181_v60 = vadd.f32 %v2110_v4, %v789_v14 }
  0xfa   : > { %v945_v47 = vmul.f32 %v913_v33, %v2134_v21  ;;  %v1021_v62 = vadd.f32 %v989_v45, %v2117_v11  ;;  %v1022_v3 = vadd.f32 %v990_v49, %v2120_v13  ;;  %v2192_v6 = vadd.f32 %v1823_v24, %v2110_v4 }
  0xfb   : > { %v979_v58 = vmul.f32 0.044715, %v947_v42  ;;  %v963_v5 = vmul.f32 %v931_v50, %v2151_v36  ;;  %1856 = vtanh.f32 %v598_v52  ;;  %v599_v9 = vmul.f32 0.7978846, %v597_v53 }
  0xfc   : > { %v1810_v30 = vpop.f32.mrb[8].mxu0  ;;  %v977_v0 = vmul.f32 0.044715, %v945_v47  ;;  %v929_v10 = vmul.f32 %v2172_v54, %v2172_v54  ;;  %v2199_v12 = vadd.f32 %v2110_v4, %v853_v29  ;;  %v1023_v14 = vadd.f32 %v991_v57, %v2126_v17 }
  0xfd   : > { %v802_v34 = vpop.f32.mrb[9].mxu0  ;;  %v1011_v15 = vadd.f32 %v979_v58, %v2129_v18  ;;  %v948_v16 = vmul.f32 %v916_v59, %v2161_v43  ;;  %v914_v19 = vmul.f32 %v2181_v60, %v2181_v60  ;;  %v1053_v22 = vmul.f32 0.7978846, %v1021_v62 }
  0xfe   : > { %v2153_v37 = vpop.f32.mrb[10].mxu0  ;;  %v1826_v44 = vpop.f32.mrb[8].mxu1  ;;  %v2208_v23 = vmul.f32 0.044715, %v960_v63  ;;  %v1009_v24 = vadd.f32 %v977_v0, %v2134_v21  ;;  %v2212_v25 = vadd.f32 %v1810_v30, %v2110_v4  ;;  %v1054_v27 = vmul.f32 0.7978846, %v1022_v3 }
  0xff   : > { %v2156_v40 = vpop.f32.mrb[11].mxu0  ;;  %v866_v48 = vpop.f32.mrb[9].mxu1  ;;  %v995_v28 = vmul.f32 0.044715, %v963_v5  ;;  %v932_v29 = vmul.f32 %v2192_v6, %v2192_v6  ;;  %v2219_v31 = vadd.f32 %v2110_v4, %v802_v34  ;;  %1858 = vtanh.f32 %v599_v9 }
 0x100   : > { %v2168_v51 = vpop.f32.mrb[10].mxu1  ;;  %v961_v35 = vmul.f32 %v929_v10, %v2172_v54  ;;  %v930_v38 = vmul.f32 %v2199_v12, %v2199_v12  ;;  %v2227_v30 = vadd.f32 %v1826_v44, %v2110_v4  ;;  %v2231_v41 = vmul.f32 0.7978846, %v1023_v14 }
 0x101   : > { %v2174_v55 = vpop.f32.mrb[11].mxu1  ;;  %v1043_v42 = vmul.f32 0.7978846, %v1011_v15  ;;  %v980_v45 = vmul.f32 0.044715, %v948_v16  ;;  %v946_v34 = vmul.f32 %v914_v19, %v2181_v60  ;;  %1860 = vtanh.f32 %v1053_v22 }
 0x102   : > { %v1041_v46 = vmul.f32 0.7978846, %v1009_v24  ;;  %v919_v47 = vmul.f32 %v2212_v25, %v2212_v25  ;;  %v2238_v49 = vadd.f32 %v2153_v37, %v2110_v4  ;;  %1862 = vtanh.f32 %v1054_v27 }
 0x103   : > { %v1027_v44 = vadd.f32 %v995_v28, %v2151_v36  ;;  %v964_v50 = vmul.f32 %v932_v29, %v2192_v6  ;;  %v917_v52 = vmul.f32 %v2219_v31, %v2219_v31  ;;  %v993_v53 = vmul.f32 0.044715, %v961_v35 }
 0x104   : > { %v2176_v56 = vpop.f32.mrb[12].mxu0  ;;  %v962_v57 = vmul.f32 %v930_v38, %v2199_v12  ;;  %v935_v58 = vmul.f32 %v2227_v30, %v2227_v30  ;;  %v2248_v59 = vadd.f32 %v2110_v4, %v866_v48  ;;  %1864 = vtanh.f32 %v1043_v42 }
 0x105   : > { %v2183_v61 = vpop.f32.mrb[13].mxu0  ;;  %v1012_v37 = vadd.f32 %v980_v45, %v2161_v43  ;;  %v978_v62 = vmul.f32 0.044715, %v946_v34  ;;  %v2253_v63 = vadd.f32 %v2110_v4, %v2156_v40  ;;  %v2257_v3 = vpop.eup %1856  ;;  %1866 = vtanh.f32 %v1041_v46 }
 0x106   : > { %v2187_v2 = vpop.f32.mrb[14].mxu0  ;;  %v2206_v20 = vpop.f32.mrb[12].mxu1  ;;  %2763 = vst [vmem:[#allocation8_spill] sm:$0xff] %v2257_v3  ;;  %v951_v5 = vmul.f32 %v919_v47, %v2212_v25  ;;  %v920_v9 = vmul.f32 %v2238_v49, %v2238_v49  ;;  %v2264_v48 = vadd.f32 %v2168_v51, %v2110_v4  ;;  %v1059_v14 = vmul.f32 0.7978846, %v1027_v44 }
 0x107   : > { %v2194_v8 = vpop.f32.mrb[15].mxu0  ;;  %v2214_v26 = vpop.f32.mrb[13].mxu1  ;;  %v996_v15 = vmul.f32 0.044715, %v964_v50  ;;  %v949_v40 = vmul.f32 %v917_v52, %v2219_v31  ;;  %v2271_v16 = vadd.f32 %v2110_v4, %v2174_v55  ;;  %v1025_v22 = vadd.f32 %v993_v53, %v2172_v54 }
 0x108   : > { %v2221_v33 = vpop.f32.mrb[14].mxu1  ;;  %v994_v24 = vmul.f32 0.044715, %v962_v57  ;;  %v967_v27 = vmul.f32 %v935_v58, %v2227_v30  ;;  %v933_v51 = vmul.f32 %v2248_v59, %v2248_v59  ;;  %v1044_v29 = vmul.f32 0.7978846, %v1012_v37 }
 0x109   : > { %v2229_v39 = vpop.f32.mrb[15].mxu1  ;;  %2764 = vst [vmem:[#allocation9_spill] sm:$0xff] %v2271_v16  ;;  %v1010_v35 = vadd.f32 %v978_v62, %v2181_v60  ;;  %v918_v38 = vmul.f32 %v2253_v63, %v2253_v63  ;;  %v2286_v55 = vadd.f32 %v2176_v56, %v2110_v4  ;;  %v2288_v42 = vpop.eup %1858  ;;  %v983_v45 = vmul.f32 0.044715, %v951_v5 }
 0x10a   : > { %2766 = vst [vmem:[#allocation11_spill] sm:$0xff] %v2288_v42  ;;  %v952_v34 = vmul.f32 %v920_v9, %v2238_v49  ;;  %v936_v46 = vmul.f32 %v2264_v48, %v2264_v48  ;;  %v2295_v47 = vadd.f32 %v2110_v4, %v2183_v61  ;;  %1868 = vtanh.f32 %v1059_v14 }
 0x10b   : > { %2765 = vst [vmem:[#allocation10_spill] sm:$0xff] %v2286_v55  ;;  %v1028_v44 = vadd.f32 %v996_v15, %v2192_v6  ;;  %v981_v50 = vmul.f32 0.044715, %v949_v40  ;;  %v934_v56 = vmul.f32 %v2271_v16, %v2271_v16  ;;  %v2300_v52 = vpop.eup %1860  ;;  %v1057_v53 = vmul.f32 0.7978846, %v1025_v22 }
 0x10c   : > { %2767 = vst [vmem:[#allocation12_spill] sm:$0xff] %v2295_v47  ;;  %v1026_v57 = vadd.f32 %v994_v24, %v2199_v12  ;;  %v999_v58 = vmul.f32 0.044715, %v967_v27  ;;  %v965_v37 = vmul.f32 %v933_v51, %v2248_v59  ;;  %v2304_v62 = vpop.eup %1862  ;;  %1870 = vtanh.f32 %v1044_v29 }
 0x10d   : > { %v1042_v61 = vmul.f32 0.7978846, %v1010_v35  ;;  %v950_v5 = vmul.f32 %v918_v38, %v2253_v63  ;;  %v923_v9 = vmul.f32 %v2286_v55, %v2286_v55  ;;  %v1015_v14 = vadd.f32 %v983_v45, %v2212_v25 }
 0x10e   : > { %v2255_v0 = vpop.f32.mrb[16].mxu1  ;;  %v984_v15 = vmul.f32 0.044715, %v952_v34  ;;  %v968_v40 = vmul.f32 %v936_v46, %v2264_v48  ;;  %v921_v22 = vmul.f32 %v2295_v47, %v2295_v47  ;;  %v2313_v24 = vpop.eup %1864  ;;  %v1060_v27 = vmul.f32 0.7978846, %v1028_v44 }
 0x10f   : > { %v2266_v10 = vpop.f32.mrb[17].mxu1  ;;  %v1013_v51 = vadd.f32 %v981_v50, %v2219_v31  ;;  %v966_v29 = vmul.f32 %v934_v56, %v2271_v16  ;;  %v2319_v35 = vadd.f32 %v2206_v20, %v2110_v4  ;;  %v2321_v38 = vpop.eup %1866  ;;  %1872 = vtanh.f32 %v1057_v53 }
 0x110   : > { %v2273_v19 = vpop.f32.mrb[18].mxu1  ;;  %v1058_v45 = vmul.f32 0.7978846, %v1026_v57  ;;  %v1031_v34 = vadd.f32 %v999_v58, %v2227_v30  ;;  %v997_v46 = vmul.f32 0.044715, %v965_v37  ;;  %v1024_v7 = vadd.f32 %v2208_v23, %v2145_v32 }
 0x111   : > { %v2279_v28 = vpop.f32.mrb[19].mxu1  ;;  %2768 = vst [vmem:[#allocation13_spill] sm:$0xff] %v2319_v35  ;;  %1874 = vtanh.f32 %v1042_v61  ;;  %v982_v44 = vmul.f32 0.044715, %v950_v5  ;;  %v955_v50 = vmul.f32 %v923_v9, %v2286_v55  ;;  %v1047_v1 = vmul.f32 0.7978846, %v1015_v14 }
 0x112   : > { %v1016_v56 = vadd.f32 %v984_v15, %v2238_v49  ;;  %v1000_v42 = vmul.f32 0.044715, %v968_v40  ;;  %v953_v20 = vmul.f32 %v921_v22, %v2295_v47  ;;  %1876 = vtanh.f32 %v1060_v27 }
 0x113   : > { %v1045_v3 = vmul.f32 0.7978846, %v1013_v51  ;;  %v998_v53 = vmul.f32 0.044715, %v966_v29  ;;  %v939_v57 = vmul.f32 %v2319_v35, %v2319_v35  ;;  %1878 = vtanh.f32 %v1058_v45 }
 0x114   : > { %v1063_v58 = vmul.f32 0.7978846, %v1031_v34  ;;  %v1029_v23 = vadd.f32 %v997_v46, %v2248_v59  ;;  %v2334_v37 = vadd.f32 %v2187_v2, %v2110_v4  ;;  %v2336_v61 = vpop.eup %1868  ;;  %v1014_v5 = vadd.f32 %v982_v44, %v2253_v63 }
 0x115   : > { %v987_v9 = vmul.f32 0.044715, %v955_v50  ;;  %v2341_v14 = vadd.f32 %v2110_v4, %v2214_v26  ;;  %1880 = vtanh.f32 %v2231_v41  ;;  %v1048_v15 = vmul.f32 0.7978846, %v1016_v56 }
 0x116   : > { %2769 = vst [vmem:[#allocation14_spill] sm:$0xff] %v2334_v37  ;;  %1882 = vtanh.f32 %v1047_v1  ;;  %v1032_v40 = vadd.f32 %v1000_v42, %v2264_v48  ;;  %v985_v22 = vmul.f32 0.044715, %v953_v20  ;;  %v2345_v27 = vpop.eup %1870  ;;  %v1056_v2 = vmul.f32 0.7978846, %v1024_v7 }
 0x117   : > { %1884 = vtanh.f32 %v1045_v3  ;;  %v1030_v51 = vadd.f32 %v998_v53, %v2271_v16  ;;  %v971_v29 = vmul.f32 %v939_v57, %v2319_v35  ;;  %v1061_v45 = vmul.f32 0.7978846, %v1029_v23 }
 0x118   : > { %1886 = vtanh.f32 %v1063_v58  ;;  %v924_v26 = vmul.f32 %v2334_v37, %v2334_v37  ;;  %v1046_v34 = vmul.f32 0.7978846, %v1014_v5  ;;  %v1019_v1 = vadd.f32 %v987_v9, %v2286_v55 }
 0x119   : > { %v937_v41 = vmul.f32 %v2341_v14, %v2341_v14  ;;  %v2356_v42 = vadd.f32 %v2273_v19, %v2110_v4  ;;  %v2358_v7 = vpop.eup %1872  ;;  %1888 = vtanh.f32 %v1048_v15  ;;  %v1064_v3 = vmul.f32 0.7978846, %v1032_v40 }
 0x11a   : > { %v1017_v46 = vadd.f32 %v985_v22, %v2295_v47  ;;  %v2363_v44 = vadd.f32 %v2110_v4, %v2194_v8  ;;  %v1062_v56 = vmul.f32 0.7978846, %v1030_v51  ;;  %v1003_v20 = vmul.f32 0.044715, %v971_v29 }
 0x11b   : > { %v2365_v50 = vpop.eup %1874  ;;  %1890 = vtanh.f32 %v1056_v2  ;;  %v956_v53 = vmul.f32 %v924_v26, %v2334_v37  ;;  %v2370_v19 = vadd.f32 %v2221_v33, %v2110_v4  ;;  %v1051_v58 = vmul.f32 0.7978846, %v1019_v1 }
 0x11c   : > { %1892 = vtanh.f32 %v1061_v45  ;;  %v2372_v57 = vpop.eup %1876  ;;  %v969_v23 = vmul.f32 %v937_v41, %v2341_v14  ;;  %v1117_v8 = vadd.f32 1.0, %v2300_v52  ;;  %v1049_v9 = vmul.f32 0.7978846, %v1017_v46 }
 0x11d   : > { %1894 = vtanh.f32 %v1046_v34  ;;  %v2376_v5 = vpop.eup %1878  ;;  %v922_v15 = vmul.f32 %v2363_v44, %v2363_v44  ;;  %v1035_v33 = vadd.f32 %v1003_v20, %v2319_v35  ;;  %v2383_v22 = vadd.f32 %v2110_v4, %v2229_v39 }
 0x11e   : > { %1896 = vtanh.f32 %v1064_v3  ;;  %v1105_v2 = vadd.f32 1.0, %v2321_v38  ;;  %v988_v52 = vmul.f32 0.044715, %v956_v53  ;;  %v940_v29 = vmul.f32 %v2370_v19, %v2370_v19 }
 0x11f   : > { %v1881_v40 = vpop.eup %1880  ;;  %1898 = vtanh.f32 %v1062_v56  ;;  %v1149_v26 = vmul.f32 0.5, %v1117_v8  ;;  %v1001_v1 = vmul.f32 0.044715, %v969_v23  ;;  %v1118_v41 = vadd.f32 1.0, %v2304_v62  ;;  %v2405_v62 = vld [vmem:[%s2747_s8] ss:$0 sm:$0xff] }
 0x120   : > { %v2386_v51 = vpop.eup %1882  ;;  %v1119_v45 = vadd.f32 1.0, %v1881_v40  ;;  %1900 = vtanh.f32 %v1051_v58  ;;  %v1137_v3 = vmul.f32 0.5, %v1105_v2  ;;  %v954_v39 = vmul.f32 %v922_v15, %v2363_v44 }
 0x121   : > { %v2390_v34 = vpop.eup %1884  ;;  %1902 = vtanh.f32 %v1049_v9  ;;  %v1067_v56 = vmul.f32 0.7978846, %v1035_v33  ;;  %v938_v20 = vmul.f32 %v2383_v22, %v2383_v22  ;;  %v2400_v53 = vadd.f32 %v2255_v0, %v2110_v4 }
 0x122   : > { %v2393_v46 = vpop.eup %1886  ;;  %v1151_v38 = vmul.f32 0.5, %v1119_v45  ;;  %v944_v58 = vmul.f32 %v2356_v42, %v2356_v42  ;;  %v1020_v8 = vadd.f32 %v988_v52, %v2334_v37  ;;  %v972_v9 = vmul.f32 %v940_v29, %v2370_v19 }
 0x123   : > { %v2409_v23 = vpop.eup %1888  ;;  %v1181_v40 = vmul.f32 %v1149_v26, %v2117_v11  ;;  %v1033_v33 = vadd.f32 %v1001_v1, %v2341_v14  ;;  %v1150_v2 = vmul.f32 0.5, %v1118_v41  ;;  %v1169_v45 = vmul.f32 %v1137_v3, %v2134_v21 }
 0x124   : > { %v1183_v15 = vmul.f32 %v1151_v38, %v2126_v17  ;;  %v1123_v35 = vadd.f32 1.0, %v2336_v61  ;;  %v986_v16 = vmul.f32 0.044715, %v954_v39  ;;  %v1107_v29 = vadd.f32 1.0, %v2313_v24 }
 0x125   : > { %v1891_v0 = vpop.eup %1890  ;;  %v970_v11 = vmul.f32 %v938_v20, %v2383_v22  ;;  %v943_v17 = vmul.f32 %v2400_v53, %v2400_v53  ;;  %v976_v26 = vmul.f32 %v944_v58, %v2356_v42  ;;  %v1220_v3 = vmul.f32 %v2405_v62, %v1181_v40 }
 0x126   : > { %v2418_v47 = vpop.eup %1892  ;;  %v1222_v55 = vmul.f32 %v2405_v62, %v1183_v15  ;;  %v1120_v52 = vadd.f32 1.0, %v1891_v0  ;;  %v1155_v21 = vmul.f32 0.5, %v1123_v35  ;;  %v1121_v39 = vadd.f32 1.0, %v2358_v7 }
 0x127   : > { %v2422_v37 = vpop.eup %1894  ;;  %1904 = vtanh.f32 %v1067_v56  ;;  %v1052_v38 = vmul.f32 0.7978846, %v1020_v8  ;;  %v1182_v20 = vmul.f32 %v1150_v2, %v2120_v13  ;;  %v1208_v15 = vmul.f32 %v2405_v62, %v1169_v45 }
 0x128   : > { %v2428_v1 = vpop.eup %1896  ;;  %v1282_v61 = vsel %vm617_vm2, %v1222_v55, 0.0  ;;  %v1152_v41 = vmul.f32 0.5, %v1120_v52  ;;  %v1004_v58 = vmul.f32 0.044715, %v972_v9  ;;  %v1139_v0 = vmul.f32 0.5, %v1107_v29 }
 0x129   : > { %v2433_v24 = vpop.eup %1898  ;;  %1283 = vadd.xlane.f32.xlu0 %v1282_v61  ;;  %v1108_v55 = vadd.f32 1.0, %v2345_v27  ;;  %v2443_v7 = vadd.f32 %v2110_v4, %v2266_v10  ;;  %v1008_v40 = vmul.f32 0.044715, %v976_v26  ;;  %v2447_v56 = vadd.f32 %v2110_v4, %v2279_v28 }
 0x12a   : > { %v1184_v35 = vmul.f32 %v1152_v41, %v2145_v32  ;;  %v2439_v52 = vpop.eup %1900  ;;  %v1187_v13 = vmul.f32 %v1155_v21, %v2151_v36  ;;  %v1276_v9 = vsel %vm617_vm2, %v1220_v3, 0.0  ;;  %v1153_v27 = vmul.f32 0.5, %v1121_v39 }
 0x12b   : > { %v2450_v8 = vpop.eup %1902  ;;  %v1106_v2 = vadd.f32 1.0, %v2365_v50  ;;  %v1065_v45 = vmul.f32 0.7978846, %v1033_v33  ;;  %v1018_v10 = vadd.f32 %v986_v16, %v2363_v44  ;;  %v1221_v29 = vmul.f32 %v2405_v62, %v1182_v20 }
 0x12c   : > { %v1223_v32 = vmul.f32 %v2405_v62, %v1184_v35  ;;  %v1240_v4 = vsel %vm617_vm2, %v1208_v15, 0.0  ;;  %v1171_v36 = vmul.f32 %v1139_v0, %v2129_v18  ;;  %v1140_v26 = vmul.f32 0.5, %v1108_v55 }
 0x12d   : > { %1277 = vadd.xlane.f32.xlu0 %v1276_v9  ;;  %v1124_v21 = vadd.f32 1.0, %v2372_v57  ;;  %v941_v61 = vmul.f32 %v2443_v7, %v2443_v7  ;;  %v1040_v50 = vadd.f32 %v1008_v40, %v2356_v42  ;;  %v942_v16 = vmul.f32 %v2447_v56, %v2447_v56 }
 0x12e   : > { %v1285_v28 = vsel %vm617_vm2, %v1223_v32, 0.0  ;;  %v1226_v33 = vmul.f32 %v2405_v62, %v1187_v13  ;;  %v1002_v41 = vmul.f32 0.044715, %v970_v11  ;;  %v1185_v3 = vmul.f32 %v1153_v27, %v2172_v54 }
 0x12f   : > { %1286 = vadd.xlane.f32.xlu1 %v1285_v28  ;;  %v1138_v39 = vmul.f32 0.5, %v1106_v2  ;;  %v1111_v18 = vadd.f32 1.0, %v2386_v51  ;;  %1906 = vtanh.f32 %v1052_v38  ;;  %v1036_v57 = vadd.f32 %v1004_v58, %v2370_v19 }
 0x130   : > { %v975_v20 = vmul.f32 %v943_v17, %v2400_v53  ;;  %v1122_v15 = vadd.f32 1.0, %v2376_v5  ;;  %v1279_v35 = vsel %vm617_vm2, %v1221_v29, 0.0  ;;  %v1210_v0 = vmul.f32 %v2405_v62, %v1171_v36 }
 0x131   : > { %1241 = vadd.xlane.f32.xlu0 %v1240_v4  ;;  %v1172_v55 = vmul.f32 %v1140_v26, %v2161_v43  ;;  %v1156_v11 = vmul.f32 0.5, %v1124_v21  ;;  %v2475_v40 = vpop.eup %1904  ;;  %v973_v54 = vmul.f32 %v941_v61, %v2443_v7  ;;  %v1072_v51 = vmul.f32 0.7978846, %v1040_v50 }
 0x132   : > { %v974_v38 = vmul.f32 %v942_v16, %v2447_v56  ;;  %v1294_v17 = vsel %vm617_vm2, %v1226_v33, 0.0  ;;  %v1224_v58 = vmul.f32 %v2405_v62, %v1185_v3  ;;  %v1170_v5 = vmul.f32 %v1138_v39, %v2181_v60 }
 0x133   : > { %1280 = vadd.xlane.f32.xlu1 %v1279_v35  ;;  %v1143_v13 = vmul.f32 0.5, %v1111_v18  ;;  %v1109_v32 = vadd.f32 1.0, %v2390_v34  ;;  %1908 = vtanh.f32 %v1065_v45  ;;  %v1007_v43 = vmul.f32 0.044715, %v975_v20 }
 0x134   : > { %v1154_v9 = vmul.f32 0.5, %v1122_v15  ;;  %v1112_v27 = vadd.f32 1.0, %v2409_v23  ;;  %v1246_v2 = vsel %vm617_vm2, %v1210_v0, 0.0  ;;  %v1211_v29 = vmul.f32 %v2405_v62, %v1172_v55 }
 0x135   : > { %1295 = vadd.xlane.f32.xlu0 %v1294_v17  ;;  %v1188_v4 = vmul.f32 %v1156_v11, %v2192_v6  ;;  %v1127_v28 = vadd.f32 1.0, %v2393_v46  ;;  %v1050_v36 = vmul.f32 0.7978846, %v1018_v10  ;;  %v1005_v26 = vmul.f32 0.044715, %v973_v54 }
 0x136   : > { %1910 = vtanh.f32 %v1072_v51  ;;  %v1006_v60 = vmul.f32 0.044715, %v974_v38  ;;  %v1288_v34 = vsel %vm617_vm2, %v1224_v58, 0.0  ;;  %v1209_v45 = vmul.f32 %v2405_v62, %v1170_v5 }
 0x137   : > { %1247 = vadd.xlane.f32.xlu1 %v1246_v2  ;;  %v1175_v21 = vmul.f32 %v1143_v13, %v2212_v25  ;;  %v1141_v23 = vmul.f32 0.5, %v1109_v32  ;;  %v1034_v61 = vadd.f32 %v1002_v41, %v2383_v22  ;;  %v1039_v50 = vadd.f32 %v1007_v43, %v2400_v53 }
 0x138   : > { %v1186_v6 = vmul.f32 %v1154_v9, %v2199_v12  ;;  %v1144_v46 = vmul.f32 0.5, %v1112_v27  ;;  %v1249_v10 = vsel %vm617_vm2, %v1211_v29, 0.0  ;;  %v1227_v16 = vmul.f32 %v2405_v62, %v1188_v4 }
 0x139   : > { %1289 = vadd.xlane.f32.xlu0 %v1288_v34  ;;  %v1110_v33 = vadd.f32 1.0, %v2422_v37  ;;  %v1159_v3 = vmul.f32 0.5, %v1127_v28  ;;  %v1907_v39 = vpop.eup %1906  ;;  %1912 = vtanh.f32 %v1050_v36  ;;  %v1068_v18 = vmul.f32 0.7978846, %v1036_v57 }
 0x13a   : > { %v1037_v25 = vadd.f32 %v1005_v26, %v2443_v7  ;;  %v1125_v41 = vadd.f32 1.0, %v2418_v47  ;;  %v1038_v20 = vadd.f32 %v1006_v60, %v2447_v56  ;;  %v1243_v12 = vsel %vm617_vm2, %v1209_v45, 0.0 }
 0x13b   : > { %1250 = vadd.xlane.f32.xlu1 %v1249_v10  ;;  %v1214_v15 = vmul.f32 %v2405_v62, %v1175_v21  ;;  %v1173_v35 = vmul.f32 %v1141_v23, %v2219_v31  ;;  %v1066_v0 = vmul.f32 0.7978846, %v1034_v61  ;;  %v1071_v55 = vmul.f32 0.7978846, %v1039_v50  ;;  %v2772_v10 = vld [vmem:[#allocation10_spill] sm:$0xff] }
 0x13c   : > { %v1176_v37 = vmul.f32 %v1144_v46, %v2238_v49  ;;  %v1128_v57 = vadd.f32 1.0, %v2428_v1  ;;  %v1297_v11 = vsel %vm617_vm2, %v1227_v16, 0.0  ;;  %v1225_v54 = vmul.f32 %v2405_v62, %v1186_v6  ;;  %v2771_v6 = vld [vmem:[#allocation11_spill] sm:$0xff] }
 0x13d   : > { %1244 = vadd.xlane.f32.xlu0 %v1243_v12  ;;  %v1142_v47 = vmul.f32 0.5, %v1110_v33  ;;  %v1191_v51 = vmul.f32 %v1159_v3, %v2227_v30  ;;  %v2508_v38 = vpop.eup %1908  ;;  %1914 = vtanh.f32 %v1068_v18  ;;  %v1069_v17 = vmul.f32 0.7978846, %v1037_v25  ;;  %v2773_v25 = vld [vmem:[#allocation9_spill] sm:$0xff] }
 0x13e   : > { %v1157_v31 = vmul.f32 0.5, %v1125_v41  ;;  %v1070_v58 = vmul.f32 0.7978846, %v1038_v20  ;;  %v1258_v5 = vsel %vm617_vm2, %v1214_v15, 0.0  ;;  %v1212_v49 = vmul.f32 %v2405_v62, %v1173_v35  ;;  %v1742_v20 = vld [vmem:[%s2743_s4] ss:$0 sm:$0xff] }
 0x13f   : > { %1298 = vadd.xlane.f32.xlu1 %v1297_v11  ;;  %v1115_v1 = vadd.f32 1.0, %v2439_v52  ;;  %1916 = vtanh.f32 %v1066_v0  ;;  %v1215_v32 = vmul.f32 %v2405_v62, %v1176_v37  ;;  %v1160_v43 = vmul.f32 0.5, %v1128_v57 }
 0x140   : > { %v1911_v13 = vpop.eup %1910  ;;  %v1126_v30 = vadd.f32 1.0, %v2433_v24  ;;  %1918 = vtanh.f32 %v1071_v55  ;;  %v1291_v9 = vsel %vm617_vm2, %v1225_v54, 0.0  ;;  %v1174_v27 = vmul.f32 %v1142_v47, %v2253_v63  ;;  %v2774_v55 = vld [vmem:[#allocation6_spill] sm:$0xff]  ;;  %v2775_v54 = vld [vmem:[#allocation12_spill] sm:$0xff] }
 0x141   : > { %1259 = vadd.xlane.f32.xlu0 %v1258_v5  ;;  %v1230_v2 = vmul.f32 %v2405_v62, %v1191_v51  ;;  %1920 = vtanh.f32 %v1069_v17  ;;  %v1189_v29 = vmul.f32 %v1157_v31, %v2248_v59  ;;  %v1113_v52 = vadd.f32 1.0, %v2450_v8  ;;  %v2770_v59 = vld [vmem:[#allocation8_spill] sm:$0xff]  ;;  %v2776_v51 = vld [vmem:[#allocation7_spill] sm:$0xff] }
 0x142   : > { %1922 = vtanh.f32 %v1070_v58  ;;  %v1252_v4 = vsel %vm617_vm2, %v1212_v49, 0.0  ;;  %v1147_v28 = vmul.f32 0.5, %v1115_v1  ;;  %v1261_v24 = vsel %vm617_vm2, %v1215_v32, 0.0 }
 0x143   : > { %1292 = vadd.xlane.f32.xlu1 %v1291_v9  ;;  %v1913_v36 = vpop.eup %1912  ;;  %v1192_v26 = vmul.f32 %v1160_v43, %v2264_v48  ;;  %v1158_v60 = vmul.f32 0.5, %v1126_v30  ;;  %v1136_v63 = vadd.f32 1.0, %v1911_v13  ;;  %v1213_v34 = vmul.f32 %v2405_v62, %v1174_v27 }
 0x144   : > { %v1306_v45 = vsel %vm617_vm2, %v1230_v2, 0.0  ;;  %v1116_v21 = vadd.f32 1.0, %v1907_v39  ;;  %v602_v23 = vadd.f32 1.0, %v2770_v59  ;;  %v1228_v8 = vmul.f32 %v2405_v62, %v1189_v29  ;;  %v2777_v2 = vld [vmem:[#allocation14_spill] sm:$0xff] }
 0x145   : > { %1253 = vadd.xlane.f32.xlu0 %v1252_v4  ;;  %v1145_v61 = vmul.f32 0.5, %v1113_v52  ;;  %v1168_v50 = vmul.f32 0.5, %v1136_v63  ;;  %v603_v46 = vadd.f32 1.0, %v2771_v6  ;;  %v1179_v16 = vmul.f32 %v1147_v28, %v2772_v10 }
 0x146   : > { %v1131_v48 = vadd.f32 1.0, %v2475_v40  ;;  %v604_v33 = vmul.f32 0.5, %v602_v23  ;;  %v1231_v18 = vmul.f32 %v2405_v62, %v1192_v26  ;;  %v1190_v39 = vmul.f32 %v1158_v60, %v2773_v25  ;;  %v2778_v26 = vld [vmem:[#allocation13_spill] sm:$0xff] }
 0x147   : > { %1262 = vadd.xlane.f32.xlu1 %v1261_v24  ;;  %v1915_v3 = vpop.eup %1914  ;;  %v1200_v41 = vmul.f32 %v1168_v50, %v2356_v42  ;;  %v605_v12 = vmul.f32 0.5, %v603_v46  ;;  %v1255_v15 = vsel %vm617_vm2, %v1213_v34, 0.0  ;;  %v1148_v35 = vmul.f32 0.5, %v1116_v21 }
 0x148   : > { %v1114_v0 = vadd.f32 1.0, %v1913_v36  ;;  %v606_v40 = vmul.f32 %v604_v33, %v2774_v55  ;;  %v1934_v37 = vmov 0   ;;  %v1300_v11 = vsel %vm617_vm2, %v1228_v8, 0.0 }
 0x149   : > { %1307 = vadd.xlane.f32.xlu0 %v1306_v45  ;;  %v1917_v57 = vpop.eup %1916  ;;  %v1177_v47 = vmul.f32 %v1145_v61, %v2775_v54  ;;  %v1239_v42 = vmul.f32 %v2405_v62, %v1200_v41  ;;  %v607_v17 = vmul.f32 %v605_v12, %v2776_v51  ;;  %v1218_v58 = vmul.f32 %v2405_v62, %v1179_v16 }
 0x14a   : > { %1851 = vset.pattern.permute.xlu0 %v1934_v37  ;;  %v1919_v31 = vpop.eup %1918  ;;  %v1163_v5 = vmul.f32 0.5, %v1131_v48  ;;  %v1129_v49 = vadd.f32 1.0, %v2508_v38  ;;  %v615_v1 = vmul.f32 %v1742_v20, %v606_v40  ;;  %v1309_v32 = vsel %vm617_vm2, %v1231_v18, 0.0 }
 0x14b   : > { %1256 = vadd.xlane.f32.xlu1 %v1255_v15  ;;  %v1921_v13 = vpop.eup %1920  ;;  %v1229_v43 = vmul.f32 %v2405_v62, %v1190_v39  ;;  %v1333_v30 = vsel %vm617_vm2, %v1239_v42, 0.0  ;;  %v616_v9 = vmul.f32 %v1742_v20, %v607_v17  ;;  %v1180_v29 = vmul.f32 %v1148_v35, %v2777_v2 }
 0x14c   : > { %v1923_v27 = vpop.eup %1922  ;;  %v1146_v52 = vmul.f32 0.5, %v1114_v0  ;;  %v1132_v4 = vadd.f32 1.0, %v1915_v3  ;;  %v618_v28 = vsel %vm617_vm2, %v615_v1, 0.0  ;;  %v1216_v38 = vmul.f32 %v2405_v62, %v1177_v47 }
 0x14d   : > { %1301 = vadd.xlane.f32.xlu0 %v1300_v11  ;;  %v621_v36 = vsel %vm617_vm2, %v616_v9, 0.0  ;;  %v1270_v24 = vsel %vm617_vm2, %v1218_v58, 0.0  ;;  %v1195_v60 = vmul.f32 %v1163_v5, %v2778_v26  ;;  %v1161_v63 = vmul.f32 0.5, %v1129_v49 }
 0x14e   : > { %v1135_v34 = vadd.f32 1.0, %v1919_v31  ;;  %v1130_v45 = vadd.f32 1.0, %v1917_v57  ;;  %v1303_v21 = vsel %vm617_vm2, %v1229_v43, 0.0  ;;  %v1219_v59 = vmul.f32 %v2405_v62, %v1180_v29 }
 0x14f   : > { %1310 = vadd.xlane.f32.xlu1 %v1309_v32  ;;  %v1178_v23 = vmul.f32 %v1146_v52, %v2363_v44  ;;  %v1164_v8 = vmul.f32 0.5, %v1132_v4  ;;  %v1264_v61 = vsel %vm617_vm2, %v1216_v38, 0.0  ;;  %v1234_v50 = vmul.f32 %v2405_v62, %v1195_v60 }
 0x150   : > { %v1193_v6 = vmul.f32 %v1161_v63, %v2341_v14  ;;  %v1167_v46 = vmul.f32 0.5, %v1135_v34  ;;  %v1133_v10 = vadd.f32 1.0, %v1921_v13  ;;  %v1162_v16 = vmul.f32 0.5, %v1130_v45 }
 0x151   : > { %1271 = vadd.xlane.f32.xlu0 %v1270_v24  ;;  %v1273_v48 = vsel %vm617_vm2, %v1219_v59, 0.0  ;;  %v1217_v33 = vmul.f32 %v2405_v62, %v1178_v23  ;;  %v1196_v3 = vmul.f32 %v1164_v8, %v2370_v19  ;;  %v1134_v18 = vadd.f32 1.0, %v1923_v27 }
 0x152   : > { %v1318_v44 = vsel %vm617_vm2, %v1234_v50, 0.0  ;;  %v1232_v25 = vmul.f32 %v2405_v62, %v1193_v6  ;;  %v1199_v39 = vmul.f32 %v1167_v46, %v2400_v53  ;;  %v1165_v41 = vmul.f32 0.5, %v1133_v10 }
 0x153   : > { %1304 = vadd.xlane.f32.xlu1 %v1303_v21  ;;  %v1267_v14 = vsel %vm617_vm2, %v1217_v33, 0.0  ;;  %v1235_v20 = vmul.f32 %v2405_v62, %v1196_v3  ;;  %v1194_v12 = vmul.f32 %v1162_v16, %v2383_v22  ;;  %v1166_v15 = vmul.f32 0.5, %v1134_v18 }
 0x154   : > { %v1312_v19 = vsel %vm617_vm2, %v1232_v25, 0.0  ;;  %v1238_v35 = vmul.f32 %v2405_v62, %v1199_v39  ;;  %v1197_v0 = vmul.f32 %v1165_v41, %v2443_v7  ;;  %v1410_v60 = vlaneseq }
 0x155   : > { %1265 = vadd.xlane.f32.xlu0 %v1264_v61  ;;  %v1321_v55 = vsel %vm617_vm2, %v1235_v20, 0.0  ;;  %v1233_v53 = vmul.f32 %v2405_v62, %v1194_v12  ;;  %v1198_v40 = vmul.f32 %v1166_v15, %v2447_v56  ;;  %v1764_v56 = vld [vmem:[#allocation3] ss:$0 sm:$0xff] }
 0x156   : > { %v1330_v37 = vsel %vm617_vm2, %v1238_v35, 0.0  ;;  %v1236_v22 = vmul.f32 %v2405_v62, %v1197_v0  ;;  %v1411_v34 = vand.u32 127, %v1410_v60  ;;  %v1413_v59 = vshrl.u32 %v1410_v60, 7 }
 0x157   : > { %1274 = vadd.xlane.f32.xlu1 %v1273_v48  ;;  %v1315_v57 = vsel %vm617_vm2, %v1233_v53, 0.0  ;;  %v1237_v11 = vmul.f32 %v2405_v62, %v1198_v40 }
 0x158   : > { %v1324_v7 = vsel %vm617_vm2, %v1236_v22, 0.0  ;;  %v1416_v23 = vadd.s32 4294967288, %v1411_v34  ;;  %v2608_v50 = vsub.s32 %v1411_v34, %v1413_v59 }
 0x159   : > { %1319 = vadd.xlane.f32.xlu0 %v1318_v44  ;;  %v1327_v54 = vsel %vm617_vm2, %v1237_v11, 0.0 }
 0x15a   : > { %v2613_v16 = vsub.s32 %v1416_v23, %v1413_v59 }
 0x15b   : > { %1268 = vadd.xlane.f32.xlu1 %v1267_v14 }
 0x15d   : > { %1313 = vadd.xlane.f32.xlu0 %v1312_v19 }
 0x15f   : > { %1322 = vadd.xlane.f32.xlu1 %v1321_v55 }
 0x161   : > { %1331 = vadd.xlane.f32.xlu0 %v1330_v37 }
 0x163   : > { %1316 = vadd.xlane.f32.xlu1 %v1315_v57 }
 0x165   : > { %1325 = vadd.xlane.f32.xlu0 %v1324_v7 }
 0x167   : > { %1328 = vadd.xlane.f32.xlu1 %v1327_v54 }
 0x16b   : > { %1334 = vadd.xlane.f32.xlu1 %v1333_v30 }
 0x16f   : > { %619 = vadd.xlane.f32.xlu1 %v618_v28 }
 0x173   : > { %622 = vadd.xlane.f32.xlu1 %v621_v36 }
 0x17b   : > { %1343 = vperm.xlu0 %1851, %v1764_v56  }
 0x1b6   : > { %v1284_v47 = vpop.xlane.xlu0 %1283 }
 0x1ba   : > { %v1278_v42 = vpop.xlane.xlu0 %1277 }
 0x1bc   : > { %v1287_v51 = vpop.xlane.xlu1 %1286 }
 0x1be   : > { %v1242_v17 = vpop.xlane.xlu0 %1241 }
 0x1c0   : > { %v1281_v31 = vpop.xlane.xlu1 %1280 }
 0x1c2   : > { %v2580_v58 = vpop.xlane.xlu0 %1295 }
 0x1c4   : > { %v1248_v62 = vpop.xlane.xlu1 %1247 }
 0x1c6   : > { %v2582_v5 = vpop.xlane.xlu0 %1289 }
 0x1c8   : > { %v1251_v49 = vpop.xlane.xlu1 %1250 }
 0x1ca   : > { %v1245_v1 = vpop.xlane.xlu0 %1244 }
 0x1cc   : > { %v2584_v13 = vpop.xlane.xlu1 %1298 }
 0x1ce   : > { %v1260_v32 = vpop.xlane.xlu0 %1259 }
 0x1d0   : > { %v2586_v43 = vpop.xlane.xlu1 %1292 }
 0x1d2   : > { %v1254_v30 = vpop.xlane.xlu0 %1253 }
 0x1d4   : > { %v1263_v9 = vpop.xlane.xlu1 %1262 }
 0x1d6   : > { %v2588_v27 = vpop.xlane.xlu0 %1307 }
 0x1d8   : > { %v1257_v29 = vpop.xlane.xlu1 %1256 }
 0x1da   : > { %v2590_v2 = vpop.xlane.xlu0 %1301 }
 0x1dc   : > { %v2592_v4 = vpop.xlane.xlu1 %1310 }
 0x1de   : > { %v1272_v52 = vpop.xlane.xlu0 %1271 }
 0x1e0   : > { %v2596_v36 = vpop.xlane.xlu1 %1304 }
 0x1e2   : > { %v1266_v28 = vpop.xlane.xlu0 %1265 }
 0x1e4   : > { %v1275_v26 = vpop.xlane.xlu1 %1274 }
 0x1e6   : > { %v2594_v38 = vpop.xlane.xlu0 %1319 }
 0x1e8   : > { %v1269_v45 = vpop.xlane.xlu1 %1268 }
 0x1ea   : > { %v2598_v24 = vpop.xlane.xlu0 %1313 }
 0x1ec   : > { %v2604_v8 = vpop.xlane.xlu1 %1322 }
 0x1ee   : > { %v2600_v63 = vpop.xlane.xlu0 %1331 }
 0x1f0   : > { %v1317_v55 = vpop.xlane.xlu1 %1316 }
 0x1f2   : > { %v2602_v21 = vpop.xlane.xlu0 %1325 }
 0x1fa   : > { %v2606_v61 = vpop.permute.xlu0 %1343 }
 0x1fb   : > { %v1346_v6 = vadd.f32 %v2606_v61, %v1242_v17  ;;  %v1347_v46 = vadd.f32 %v2606_v61, %v1245_v1  ;;  %v1348_v10 = vadd.f32 %v2606_v61, %v1248_v62  ;;  %v1349_v48 = vadd.f32 %v2606_v61, %v1251_v49 }
 0x1fc   : > { %v1350_v33 = vadd.f32 %v2606_v61, %v1254_v30  ;;  %v1351_v3 = vadd.f32 %v2606_v61, %v1257_v29  ;;  %v1352_v18 = vadd.f32 %v2606_v61, %v1260_v32  ;;  %v1353_v44 = vadd.f32 %v2606_v61, %v1263_v9 }
 0x1fd   : > { %v1354_v25 = vadd.f32 %v2606_v61, %v1266_v28  ;;  %v1355_v39 = vadd.f32 %v2606_v61, %v1269_v45  ;;  %v1356_v41 = vadd.f32 %v2606_v61, %v1272_v52  ;;  %v1357_v14 = vadd.f32 %v2606_v61, %v1275_v26  ;;  %v1329_v52 = vpop.xlane.xlu1 %1328 }
 0x1fe   : > { %v1358_v20 = vadd.f32 %v2606_v61, %v1278_v42  ;;  %v1359_v12 = vadd.f32 %v2606_v61, %v1281_v31  ;;  %v1360_v15 = vadd.f32 %v2606_v61, %v1284_v47  ;;  %v1415_v19 = vrot.slane %v1346_v6, %v2608_v50 }
 0x1ff   : > { %v1420_v35 = vrot.slane %v1347_v46, %v2613_v16  ;;  %v1426_v0 = vrot.slane %v1348_v10, %v2608_v50  ;;  %v1361_v53 = vadd.f32 %v2606_v61, %v1287_v51  ;;  %v1430_v40 = vrot.slane %v1349_v48, %v2613_v16 }
 0x200   : > { %v1435_v37 = vrot.slane %v1350_v33, %v2608_v50  ;;  %v1439_v22 = vrot.slane %v1351_v3, %v2613_v16  ;;  %v1444_v11 = vrot.slane %v1352_v18, %v2608_v50  ;;  %v1448_v7 = vrot.slane %v1353_v44, %v2613_v16 }
 0x201   : > { %v1422_v57 = vsel %vm1421_vm3, %v1420_v35, %v1415_v19  ;;  %v1453_v54 = vrot.slane %v1354_v25, %v2608_v50  ;;  %v1431_v56 = vsel %vm1421_vm3, %v1430_v40, %v1426_v0  ;;  %v1457_v42 = vrot.slane %v1355_v39, %v2613_v16 }
 0x202   : > { %v1440_v47 = vsel %vm1421_vm3, %v1439_v22, %v1435_v37  ;;  %v1462_v51 = vrot.slane %v1356_v41, %v2608_v50  ;;  %v1466_v17 = vrot.slane %v1357_v14, %v2613_v16  ;;  %v1471_v31 = vrot.slane %v1358_v20, %v2608_v50 }
 0x203   : > { %v1475_v62 = vrot.slane %v1359_v12, %v2613_v16  ;;  %v1480_v49 = vrot.slane %v1360_v15, %v2608_v50  ;;  %v1484_v1 = vrot.slane %v1361_v53, %v2613_v16  ;;  %v1559_v32 = vsel %vm1558_vm4, %v1431_v56, %v1422_v57 }
 0x204   : > { %v1449_v30 = vsel %vm1421_vm3, %v1448_v7, %v1444_v11  ;;  %v1458_v9 = vsel %vm1421_vm3, %v1457_v42, %v1453_v54  ;;  %v1561_v29 = vsel %vm1560_vm5, %v1440_v47, %v1559_v32  ;;  %v1467_v28 = vsel %vm1421_vm3, %v1466_v17, %v1462_v51 }
 0x205   : > { %v1476_v26 = vsel %vm1421_vm3, %v1475_v62, %v1471_v31  ;;  %v1563_v60 = vsel %vm1562_vm6, %v1449_v30, %v1561_v29  ;;  %v1362_v34 = vadd.f32 %v2606_v61, %v2582_v5  ;;  %v1485_v45 = vsel %vm1421_vm3, %v1484_v1, %v1480_v49  ;;  %v1743_v29 = vld [vmem:[#allocation2] ss:$0 sm:$0xff] }
 0x206   : > { %v1565_v59 = vsel %vm1564_vm7, %v1458_v9, %v1563_v60  ;;  %v1363_v23 = vadd.f32 %v2606_v61, %v2586_v43  ;;  %v1364_v6 = vadd.f32 %v2606_v61, %v2580_v58  ;;  %v1365_v10 = vadd.f32 %v2606_v61, %v2584_v13  ;;  %v1766_v58 = vld [vmem:[%s2748_s11] ss:$0 sm:$0xff] }
 0x207   : > { %v1567_v46 = vsel %vm1566_vm8, %v1467_v28, %v1565_v59  ;;  %v1366_v48 = vadd.f32 %v2606_v61, %v2590_v2  ;;  %v1367_v5 = vadd.f32 %v2606_v61, %v2596_v36  ;;  %v1368_v13 = vadd.f32 %v2606_v61, %v2588_v27 }
 0x208   : > { %v1569_v43 = vsel %vm1568_vm9, %v1476_v26, %v1567_v46  ;;  %v1369_v2 = vadd.f32 %v2606_v61, %v2592_v4  ;;  %v1370_v36 = vadd.f32 %v2606_v61, %v2598_v24  ;;  %v1371_v3 = vadd.f32 %v2606_v61, %v1317_v55  ;;  %v1335_v24 = vpop.xlane.xlu1 %1334  ;;  %v1765_v26 = vld [vmem:[#allocation4] ss:$0 sm:$0xff] }
 0x209   : > { %v1571_v33 = vsel %vm1570_vm10, %v1485_v45, %v1569_v43  ;;  %v1372_v18 = vadd.f32 %v2606_v61, %v2594_v38  ;;  %v1373_v44 = vadd.f32 %v2606_v61, %v2604_v8  ;;  %v1374_v27 = vadd.f32 %v2606_v61, %v2602_v21 }
 0x20a   : > { %v1582_v25 = vsel %vm1581_vm11, %v1571_v33, 0.0  ;;  %v1489_v4 = vrot.slane %v1362_v34, %v2608_v50  ;;  %v1493_v39 = vrot.slane %v1363_v23, %v2613_v16  ;;  %v1498_v14 = vrot.slane %v1364_v6, %v2608_v50  ;;  %v1767_v34 = vld [vmem:[#allocation5] ss:$0 sm:$0xff] }
 0x20b   : > { %v1600_v41 = vmul.f32 %v1766_v58, %v1582_v25  ;;  %1620 = vst [vmem:[%s2673_s28] sm:$0xff] %v1582_v25  ;;  %v1502_v20 = vrot.slane %v1365_v10, %v2613_v16  ;;  %v1507_v38 = vrot.slane %v1366_v48, %v2608_v50  ;;  %v1375_v8 = vadd.f32 %v2606_v61, %v1329_v52 }
 0x20c   : > { %v1376_v12 = vadd.f32 %v2606_v61, %v2600_v63  ;;  %v1377_v21 = vadd.f32 %v2606_v61, %v1335_v24  ;;  %v1511_v15 = vrot.slane %v1367_v5, %v2613_v16  ;;  %v1494_v19 = vsel %vm1421_vm3, %v1493_v39, %v1489_v4  ;;  %v620_v9 = vpop.xlane.xlu1 %619 }
 0x20d   : > { %1602 = vadd.xlane.f32.xlu1 %v1600_v41  ;;  %v1503_v35 = vsel %vm1421_vm3, %v1502_v20, %v1498_v14  ;;  %v1516_v0 = vrot.slane %v1368_v13, %v2608_v50  ;;  %v1520_v55 = vrot.slane %v1369_v2, %v2613_v16  ;;  %v1525_v40 = vrot.slane %v1370_v36, %v2608_v50 }
 0x20e   : > { %v1512_v53 = vsel %vm1421_vm3, %v1511_v15, %v1507_v38  ;;  %v1529_v37 = vrot.slane %v1371_v3, %v2613_v16  ;;  %v1534_v63 = vrot.slane %v1372_v18, %v2608_v50  ;;  %v1538_v61 = vrot.slane %v1373_v44, %v2613_v16 }
 0x20f   : > { %v1543_v22 = vrot.slane %v1374_v27, %v2608_v50  ;;  %v1547_v57 = vrot.slane %v1375_v8, %v2613_v16  ;;  %v1572_v11 = vsel %vm1558_vm4, %v1503_v35, %v1494_v19  ;;  %v1521_v7 = vsel %vm1421_vm3, %v1520_v55, %v1516_v0 }
 0x210   : > { %v1552_v54 = vrot.slane %v1376_v12, %v2608_v50  ;;  %v1556_v56 = vrot.slane %v1377_v21, %v2613_v16  ;;  %v1573_v47 = vsel %vm1560_vm5, %v1512_v53, %v1572_v11  ;;  %v1530_v42 = vsel %vm1421_vm3, %v1529_v37, %v1525_v40  ;;  %v623_v28 = vpop.xlane.xlu1 %622 }
 0x211   : > { %v1574_v51 = vsel %vm1562_vm6, %v1521_v7, %v1573_v47  ;;  %v1539_v17 = vsel %vm1421_vm3, %v1538_v61, %v1534_v63  ;;  %v1548_v62 = vsel %vm1421_vm3, %v1547_v57, %v1543_v22  ;;  %v631_v52 = vadd.f32 %v1743_v29, %v620_v9 }
 0x212   : > { %v1575_v31 = vsel %vm1564_vm7, %v1530_v42, %v1574_v51  ;;  %v1557_v1 = vsel %vm1421_vm3, %v1556_v56, %v1552_v54  ;;  %v632_v6 = vadd.f32 %v1743_v29, %v623_v28 }
 0x213   : > { %v1576_v49 = vsel %vm1566_vm8, %v1539_v17, %v1575_v31  ;;  %v1591_v60 = vmul.f32 %v1765_v26, %v631_v52 }
 0x214   : > { %v1577_v50 = vsel %vm1568_vm9, %v1548_v62, %v1576_v49  ;;  %v1592_v46 = vmul.f32 %v1765_v26, %v632_v6 }
 0x215   : > { %v1578_v16 = vsel %vm1570_vm10, %v1557_v1, %v1577_v50 }
 0x216   : > { %v1583_v32 = vsel %vm1581_vm11, %v1578_v16, 0.0 }
 0x217   : > { %v1601_v30 = vmul.f32 %v1766_v58, %v1583_v32  ;;  %1621 = vst [vmem:[%s2673_s28 + $0x8] sm:$0xff] %v1583_v32 }
 0x219   : > { %1604 = vadd.xlane.f32.xlu1 %v1601_v30 }
 0x29a   : > { %v1603_v45 = vpop.xlane.xlu1 %1602 }
 0x29b   : > { %v1606_v59 = vadd.f32 %v1603_v45, %v1591_v60 }
 0x29d   : > { %v1615_v23 = vadd.f32 %v1767_v34, %v1606_v59 }
 0x29f   : > { %1618 = vst.msk [vmem:[%s510_s18] sm:$0xff] %vm1617_vm12, %v1615_v23 }
 0x2a6   : > { %v1605_v10 = vpop.xlane.xlu1 %1604 }
 0x2a7   : > { %v1607_v48 = vadd.f32 %v1605_v10, %v1592_v46 }
 0x2a9   : > { %v1616_v5 = vadd.f32 %v1767_v34, %v1607_v48 }
 0x2ab   : > { %1619 = vst.msk [vmem:[%s510_s18 + $0x8] sm:$0xff] %vm1617_vm12, %v1616_v5 }
 0x2ac PF: > { %s33_s21 = sadd.s32 1, %s1930_s21  }
 0x2ad   : > { %p30_p5 = scmp.ge.s32.totalorder %s33_s21, 4  }
 0x2af   :  { %32 = sbr.rel (!%p30_p5) target bundleno = 4 (0x4), region = 117 }

</bundles_post_ra>
